<compile_context>
chip_gen: v5e
topology: v5e:2x2
jax: 0.10.0
libtpu: 0.0.40
codegen_flags: <defaults>
</compile_context>

<pallas_src>
import jax
import jax.numpy as jnp
from jax import lax
from jax.experimental import pallas as pl
from jax.experimental.pallas import tpu as pltpu

HIDDEN = 256
LN_EPS = 1e-5  # nn.LayerNorm default
LANE = 128


def _round_up(n, m):
    return ((n + m - 1) // m) * m


def domain_classifier_kernel(x_ref, w0_ref, b0_ref, g_ref, beta_ref,
                             w1_ref, b1_ref, o_ref):
    # hidden_0: x @ W0 + b0  (MXU matmul, f32 accumulate)
    h = jnp.dot(x_ref[...], w0_ref[...], preferred_element_type=jnp.float32)
    h = h + b0_ref[...]                       # (tb, 256) + (1, 256), f32

    # ReLU
    h = jnp.maximum(h, 0.0)

    # LayerNorm over last dim (biased variance, like torch) — all f32
    mean = jnp.mean(h, axis=-1, keepdims=True)
    centered = h - mean
    var = jnp.mean(centered * centered, axis=-1, keepdims=True)
    h = centered * lax.rsqrt(var + LN_EPS)
    h = h * g_ref[...] + beta_ref[...]

    # hidden_classes: h @ W1 + b1 (cast only the dot operand to W1's dtype)
    out = jnp.dot(h.astype(w1_ref.dtype), w1_ref[...],
                  preferred_element_type=jnp.float32)
    out = out + b1_ref[...]
    o_ref[...] = out.astype(o_ref.dtype)


def domain_classifier(x, w0, b0, gamma, beta, w1, b1, *,
                      batch_tile=128, matmul_dtype=None):
    """Forward pass of DomainClassifier.

    x:     (B, input_size)
    w0:    (input_size, 256), b0: (256,)
    gamma: (256,), beta: (256,)
    w1:    (256, output_size), b1: (output_size,)
    matmul_dtype: optional dtype (e.g. jnp.bfloat16) for the matmul operands
                  on v6e/v7x; accumulation and LayerNorm stay f32.
    """
    B, in_size = x.shape
    out_size = w1.shape[1]
    orig_dtype = x.dtype

    # Tile selection: big tiles to fill the MXU, but don't blow up tiny batches.
    batch_tile = max(8, min(batch_tile, _round_up(B, 8)))

    # Lane-dense padded extents (zero padding keeps results exact).
    in_pad = _round_up(in_size, LANE)
    out_pad = _round_up(out_size, LANE)
    b_pad = _round_up(B, batch_tile)

    if matmul_dtype is not None:
        x = x.astype(matmul_dtype)
        w0 = w0.astype(matmul_dtype)
        w1 = w1.astype(matmul_dtype)

    x_p = jnp.pad(x, ((0, b_pad - B), (0, in_pad - in_size)))
    w0_p = jnp.pad(w0, ((0, in_pad - in_size), (0, 0)))
    w1_p = jnp.pad(w1, ((0, 0), (0, out_pad - out_size)))

    # Biases / LayerNorm params stay f32 and 2D (1, N) for clean lane layout.
    b0_2d = b0.astype(jnp.float32).reshape(1, HIDDEN)
    g_2d = gamma.astype(jnp.float32).reshape(1, HIDDEN)
    be_2d = beta.astype(jnp.float32).reshape(1, HIDDEN)
    b1_2d = jnp.pad(b1.astype(jnp.float32),
                    ((0, out_pad - out_size),)).reshape(1, out_pad)

    grid = (b_pad // batch_tile,)

    out = pl.pallas_call(
        domain_classifier_kernel,
        out_shape=jax.ShapeDtypeStruct((b_pad, out_pad), orig_dtype),
        grid_spec=pl.GridSpec(
            grid=grid,
            in_specs=[
                pl.BlockSpec((batch_tile, in_pad), lambda i: (i, 0)),
                # Grid-invariant operands (constant index maps): weights,
                # biases, LN params.
                pl.BlockSpec((in_pad, HIDDEN), lambda i: (0, 0)),
                pl.BlockSpec((1, HIDDEN), lambda i: (0, 0)),
                pl.BlockSpec((1, HIDDEN), lambda i: (0, 0)),
                pl.BlockSpec((1, HIDDEN), lambda i: (0, 0)),
                pl.BlockSpec((HIDDEN, out_pad), lambda i: (0, 0)),
                pl.BlockSpec((1, out_pad), lambda i: (0, 0)),
            ],
            out_specs=pl.BlockSpec((batch_tile, out_pad), lambda i: (i, 0)),
        ),
        compiler_params=pltpu.CompilerParams(
            dimension_semantics=("parallel",)),
    )(x_p, w0_p, b0_2d, g_2d, be_2d, w1_p, b1_2d)

    # Strip batch / output-lane padding.
    return out[:B, :out_size]


def reference(x, w0, b0, gamma, beta, w1, b1):
    h = x @ w0 + b0
    h = jnp.maximum(h, 0.0)
    mean = jnp.mean(h, axis=-1, keepdims=True)
    var = jnp.mean((h - mean) ** 2, axis=-1, keepdims=True)
    h = (h - mean) / jnp.sqrt(var + LN_EPS)
    h = h * gamma + beta
    return h @ w1 + b1


if __name__ == "__main__":
    key = jax.random.PRNGKey(0)
    # Ragged batch (not a multiple of the 128-row tile) + small feature dims
    # exercise the padding / tail handling; 2 grid steps feed both v7x cores.
    B, input_size, output_size = 200, 32, 8

    k = jax.random.split(key, 8)
    x = jax.random.normal(k[0], (B, input_size), dtype=jnp.float32)
    # deterministic synthetic params (shapes per nn.Linear / nn.LayerNorm)
    w0 = jax.random.normal(k[1], (input_size, HIDDEN), jnp.float32) * 0.05
    b0 = jax.random.normal(k[2], (HIDDEN,), jnp.float32) * 0.01
    gamma = jnp.ones((HIDDEN,), jnp.float32) + \
        0.1 * jax.random.normal(k[3], (HIDDEN,), jnp.float32)
    beta = 0.1 * jax.random.normal(k[4], (HIDDEN,), jnp.float32)
    w1 = jax.random.normal(k[5], (HIDDEN, output_size), jnp.float32) * 0.05
    b1 = jax.random.normal(k[6], (output_size,), jnp.float32) * 0.01

    ref = reference(x, w0, b0, gamma, beta, w1, b1)

    # f32 matmul operands: exact-path check.
    out_f32 = domain_classifier(x, w0, b0, gamma, beta, w1, b1,
                                batch_tile=128)
    out_f32 = jax.block_until_ready(out_f32)
    assert out_f32.shape == (B, output_size)
    assert jnp.allclose(out_f32, ref, atol=1e-4, rtol=1e-4), \
        "f32 kernel mismatch vs reference"

    # bf16 matmul operands (v6e/v7x roofline path): f32 accumulation + f32
    # LayerNorm keep the error small; tolerance loosened accordingly.
    out_bf16 = domain_classifier(x, w0, b0, gamma, beta, w1, b1,
                                 batch_tile=128, matmul_dtype=jnp.bfloat16)
    out_bf16 = jax.block_until_ready(out_bf16)
    assert out_bf16.shape == (B, output_size)
    assert jnp.allclose(out_bf16, ref, atol=5e-2, rtol=5e-2), \
        "bf16 kernel mismatch vs reference"

    print("KERNEL_OK")
</pallas_src>

<mosaic_0001>
module attributes {stable_mosaic.version = 11 : i64} {
  func.func @domain_classifier_kernel(%arg0: i32, %arg1: memref<128x128xf32, #tpu.memory_space<vmem>>, %arg2: memref<128x256xf32, #tpu.memory_space<vmem>>, %arg3: memref<1x256xf32, #tpu.memory_space<vmem>>, %arg4: memref<1x256xf32, #tpu.memory_space<vmem>>, %arg5: memref<1x256xf32, #tpu.memory_space<vmem>>, %arg6: memref<256x128xf32, #tpu.memory_space<vmem>>, %arg7: memref<1x128xf32, #tpu.memory_space<vmem>>, %arg8: memref<128x128xf32, #tpu.memory_space<vmem>>) attributes {dimension_semantics = [#tpu.dimension_semantics<parallel>], iteration_bounds = array<i64: 2>, scalar_prefetch = 0 : i64, scratch_operands = 0 : i64, tpu.core_type = #tpu.core_type<tc>, window_params = [{transform_indices = @transform_0, window_bounds = array<i64: 128, 128>}, {pipeline_mode = #tpu.pipeline_mode<synchronous>, transform_indices = @transform_1, window_bounds = array<i64: 128, 256>}, {pipeline_mode = #tpu.pipeline_mode<synchronous>, transform_indices = @transform_2, window_bounds = array<i64: 1, 256>}, {pipeline_mode = #tpu.pipeline_mode<synchronous>, transform_indices = @transform_3, window_bounds = array<i64: 1, 256>}, {pipeline_mode = #tpu.pipeline_mode<synchronous>, transform_indices = @transform_4, window_bounds = array<i64: 1, 256>}, {pipeline_mode = #tpu.pipeline_mode<synchronous>, transform_indices = @transform_5, window_bounds = array<i64: 256, 128>}, {pipeline_mode = #tpu.pipeline_mode<synchronous>, transform_indices = @transform_6, window_bounds = array<i64: 1, 128>}, {transform_indices = @transform_7, window_bounds = array<i64: 128, 128>}]} {
    %c0 = arith.constant 0 : index
    %c0_0 = arith.constant 0 : index
    %0 = vector.load %arg1[%c0, %c0_0] : memref<128x128xf32, #tpu.memory_space<vmem>>, vector<128x128xf32>
    %c0_1 = arith.constant 0 : index
    %c0_2 = arith.constant 0 : index
    %1 = vector.load %arg2[%c0_1, %c0_2] : memref<128x256xf32, #tpu.memory_space<vmem>>, vector<128x256xf32>
    %cst = arith.constant dense<0.000000e+00> : vector<128x256xf32>
    %2 = tpu.matmul %0, %1, %cst {dimension_numbers = #tpu.dot_dimension_numbers<[1], [0], [0], [1], [0, 0, 1, 1], [], []>} : vector<128x128xf32>, vector<128x256xf32>, vector<128x256xf32> -> vector<128x256xf32>
    %c0_3 = arith.constant 0 : index
    %c0_4 = arith.constant 0 : index
    %3 = vector.load %arg3[%c0_3, %c0_4] : memref<1x256xf32, #tpu.memory_space<vmem>>, vector<1x256xf32>
    %4 = vector.broadcast %3 : vector<1x256xf32> to vector<128x256xf32>
    %5 = arith.addf %2, %4 : vector<128x256xf32>
    %cst_5 = arith.constant 0.000000e+00 : f32
    %6 = vector.broadcast %cst_5 : f32 to vector<128x256xf32>
    %7 = arith.maximumf %5, %6 : vector<128x256xf32>
    %cst_6 = arith.constant dense<0.000000e+00> : vector<128xf32>
    %8 = vector.multi_reduction <add>, %7, %cst_6 [1] : vector<128x256xf32> to vector<128xf32>
    %9 = vector.shape_cast %8 : vector<128xf32> to vector<128x1xf32>
    %cst_7 = arith.constant 2.560000e+02 : f32
    %10 = vector.broadcast %cst_7 : f32 to vector<128x1xf32>
    %11 = arith.divf %9, %10 : vector<128x1xf32>
    %12 = vector.broadcast %11 : vector<128x1xf32> to vector<128x256xf32>
    %13 = arith.subf %7, %12 : vector<128x256xf32>
    %14 = arith.mulf %13, %13 : vector<128x256xf32>
    %cst_8 = arith.constant dense<0.000000e+00> : vector<128xf32>
    %15 = vector.multi_reduction <add>, %14, %cst_8 [1] : vector<128x256xf32> to vector<128xf32>
    %16 = vector.shape_cast %15 : vector<128xf32> to vector<128x1xf32>
    %cst_9 = arith.constant 2.560000e+02 : f32
    %17 = vector.broadcast %cst_9 : f32 to vector<128x1xf32>
    %18 = arith.divf %16, %17 : vector<128x1xf32>
    %cst_10 = arith.constant 9.99999974E-6 : f32
    %19 = vector.broadcast %cst_10 : f32 to vector<128x1xf32>
    %20 = arith.addf %18, %19 : vector<128x1xf32>
    %21 = math.rsqrt %20 : vector<128x1xf32>
    %22 = vector.broadcast %21 : vector<128x1xf32> to vector<128x256xf32>
    %23 = arith.mulf %13, %22 : vector<128x256xf32>
    %c0_11 = arith.constant 0 : index
    %c0_12 = arith.constant 0 : index
    %24 = vector.load %arg4[%c0_11, %c0_12] : memref<1x256xf32, #tpu.memory_space<vmem>>, vector<1x256xf32>
    %25 = vector.broadcast %24 : vector<1x256xf32> to vector<128x256xf32>
    %26 = arith.mulf %23, %25 : vector<128x256xf32>
    %c0_13 = arith.constant 0 : index
    %c0_14 = arith.constant 0 : index
    %27 = vector.load %arg5[%c0_13, %c0_14] : memref<1x256xf32, #tpu.memory_space<vmem>>, vector<1x256xf32>
    %28 = vector.broadcast %27 : vector<1x256xf32> to vector<128x256xf32>
    %29 = arith.addf %26, %28 : vector<128x256xf32>
    %c0_15 = arith.constant 0 : index
    %c0_16 = arith.constant 0 : index
    %30 = vector.load %arg6[%c0_15, %c0_16] : memref<256x128xf32, #tpu.memory_space<vmem>>, vector<256x128xf32>
    %cst_17 = arith.constant dense<0.000000e+00> : vector<128x128xf32>
    %31 = tpu.matmul %29, %30, %cst_17 {dimension_numbers = #tpu.dot_dimension_numbers<[1], [0], [0], [1], [0, 0, 1, 1], [], []>} : vector<128x256xf32>, vector<256x128xf32>, vector<128x128xf32> -> vector<128x128xf32>
    %c0_18 = arith.constant 0 : index
    %c0_19 = arith.constant 0 : index
    %32 = vector.load %arg7[%c0_18, %c0_19] : memref<1x128xf32, #tpu.memory_space<vmem>>, vector<1x128xf32>
    %33 = vector.broadcast %32 : vector<1x128xf32> to vector<128x128xf32>
    %34 = arith.addf %31, %33 : vector<128x128xf32>
    %c0_20 = arith.constant 0 : index
    %c0_21 = arith.constant 0 : index
    %35 = vector.load %arg8[%c0_20, %c0_21] : memref<128x128xf32, #tpu.memory_space<vmem>>, vector<128x128xf32>
    tpu.vector_store %arg8[%c0_20, %c0_21], %34 {strides = array<i32>} : memref<128x128xf32, #tpu.memory_space<vmem>>, vector<128x128xf32>,
    return
  }
  func.func @transform_0(%arg0: i32) -> (i32, i32) {
    %c0_i32 = arith.constant 0 : i32
    %c0_i32_0 = arith.constant 0 : i32
    return %arg0, %c0_i32 : i32, i32
  }
  func.func @transform_1(%arg0: i32) -> (i32, i32) {
    %c0_i32 = arith.constant 0 : i32
    %c0_i32_0 = arith.constant 0 : i32
    %c0_i32_1 = arith.constant 0 : i32
    return %c0_i32, %c0_i32_0 : i32, i32
  }
  func.func @transform_2(%arg0: i32) -> (i32, i32) {
    %c0_i32 = arith.constant 0 : i32
    %c0_i32_0 = arith.constant 0 : i32
    %c0_i32_1 = arith.constant 0 : i32
    return %c0_i32, %c0_i32_0 : i32, i32
  }
  func.func @transform_3(%arg0: i32) -> (i32, i32) {
    %c0_i32 = arith.constant 0 : i32
    %c0_i32_0 = arith.constant 0 : i32
    %c0_i32_1 = arith.constant 0 : i32
    return %c0_i32, %c0_i32_0 : i32, i32
  }
  func.func @transform_4(%arg0: i32) -> (i32, i32) {
    %c0_i32 = arith.constant 0 : i32
    %c0_i32_0 = arith.constant 0 : i32
    %c0_i32_1 = arith.constant 0 : i32
    return %c0_i32, %c0_i32_0 : i32, i32
  }
  func.func @transform_5(%arg0: i32) -> (i32, i32) {
    %c0_i32 = arith.constant 0 : i32
    %c0_i32_0 = arith.constant 0 : i32
    %c0_i32_1 = arith.constant 0 : i32
    return %c0_i32, %c0_i32_0 : i32, i32
  }
  func.func @transform_6(%arg0: i32) -> (i32, i32) {
    %c0_i32 = arith.constant 0 : i32
    %c0_i32_0 = arith.constant 0 : i32
    %c0_i32_1 = arith.constant 0 : i32
    return %c0_i32, %c0_i32_0 : i32, i32
  }
  func.func @transform_7(%arg0: i32) -> (i32, i32) {
    %c0_i32 = arith.constant 0 : i32
    %c0_i32_0 = arith.constant 0 : i32
    return %arg0, %c0_i32 : i32, i32
  }
}

</mosaic_0001>

<bundles_post_ra>
// kernel: tpu_custom_call.1
= control target key start
LH: loop header
LB: loop body
LE: loop exit
PB: predicated region body
PF: predicated region fallthrough
CT: control target
= control target key end

     0   :  { %s2586_s0 = inlined_call_operand.hbm [shape: f32[256,128], index: 0, kind: input, shape index: {}]   ;;  %s2587_s1 = inlined_call_operand.hbm [shape: f32[128,256], index: 1, kind: input, shape index: {}]   ;;  %s2588_s2 = inlined_call_operand.hbm [shape: f32[1,256], index: 2, kind: input, shape index: {}]   ;;  %s2589_s3 = inlined_call_operand.vmem [shape: f32[1,256], index: 3, kind: input, shape index: {}]   ;;  %s2590_s4 = inlined_call_operand.hbm [shape: f32[1,256], index: 4, kind: input, shape index: {}]   ;;  %s2591_s5 = inlined_call_operand.hbm [shape: f32[256,128], index: 5, kind: input, shape index: {}]   ;;  %s2592_s6 = inlined_call_operand.vmem [shape: f32[1,128], index: 6, kind: input, shape index: {}]   ;;  %s2593_s7 = inlined_call_operand.hbm [shape: f32[256,128], index: 7, kind: output, shape index: {}]  }
   0x1   :  { %2601 = sst [smem:[#allocation16_spill]] %s2587_s1 }
   0x2   :  { %12 = vsyncpa [#allocation3], 0 }
   0x3   :  { %14 = vsyncpa [#allocation3 + $0x1], 0 }
   0x4   :  { %15 = vsyncpa [#allocation6], 0 }
   0x5   :  { %16 = vsyncpa [#allocation9], 0 }
   0x6   :  { %17 = vsyncpa [#allocation4], 0 }
   0x7   :  { %19 = vsyncpa [#allocation4 + $0x1], 0  ;;  %s1801_s24 = smov 0   ;;  %s1803_s25 = smov 0  }
   0x8   :  { %s1805_s26 = smov 0   ;;  %s1807_s27 = smov 0  }
   0x9 LB: > { %s1822_s28 = sadd.s32 4294967295, %s1748_s27   ;;  %s1371_s29 = sadd.s32 4294967294, %s1748_s27   ;;  %s1748_s27 = sphi %s1807_s27, %s2620_s27   ;;  %s1744_s26 = sphi %s1805_s26, %s2619_s26   ;;  %s1740_s25 = sphi %s1803_s25, %s2618_s25   ;;  %s1736_s24 = sphi %s1801_s24, %s2617_s24  }
   0xa   : > { %p45_p0 = scmp.ne.s32.totalorder %s1740_s25, %s1736_s24  ;;  %p46_p1 = scmp.eq.s32.totalorder %s1822_s28, 0 }
   0xb   : > { %p195_p2 = scmp.eq.s32.totalorder %s1822_s28, 1  ;;  %p201_p3 = scmp.eq.s32.totalorder %s1371_s29, 1 }
   0xc   : > { %p1831_p4 = por %p46_p1, %p45_p0  ;;  %p1372_p5 = scmp.ge.s32.totalorder %s1748_s27, 1 }
   0xd   : > { %p1836_p6 = por %p201_p3, %p45_p0  ;;  %p208_p7 = scmp.lt.s32.totalorder %s1748_s27, 3 }
   0xe   : > { %s2604_s1 = sld [smem:[#allocation16_spill]]  ;;  %s1750_s13 = smov [#allocation5]  }
   0xf   : > { %p1844_p8 = pnand %p1372_p5, %p208_p7  ;;  %s221_s14 = sshll.u32 %s1750_s13, 4  ;;  %s222_s14 = int_to_ptr.vmem [resolvable:$true] %s221_s14 }
  0x10   : > { %s249_s18 = sshll.u32 %s2590_s4, 4  ;;  %s1751_s19 = smov 256   ;;  %s250_s18 = int_to_ptr.hbm [resolvable:$true] %s249_s18 }
  0x11   : > { %p1415_p9 = pneg %p1844_p8  ;;  %s1752_s20 = smov 16  }
  0x12   : > { %s1753_s21 = smov [#allocation8]   ;;  %s234_s9 = sshll.u32 %s2588_s2, 4  ;;  %s235_s9 = int_to_ptr.hbm [resolvable:$true] %s234_s9 }
  0x13   : > { %p1852_p10 = pnand %p1415_p9, %p46_p1  ;;  %s251_s22 = sshll.u32 %s1753_s21, 4  ;;  %s252_s22 = int_to_ptr.vmem [resolvable:$true] %s251_s22 }
  0x14   : > { %s219_s11 = sshll.u32 %s2604_s1, 4  ;;  %s260_s16 = sshll.u32 %s2591_s5, 4  ;;  %s220_s11 = int_to_ptr.hbm [resolvable:$true] %s219_s11  ;;  %s261_s16 = int_to_ptr.hbm [resolvable:$true] %s260_s16 }
  0x15   : > { %1418 = dma.hbm_to_vmem [thread:$0]  (!%p1852_p10), %s220_s11, 4096, %s222_s14, [#allocation6], %s1751_s19, %s1751_s19, %s1752_s20  }
  0x16   : > { %1424 = dma.hbm_to_vmem [thread:$0]  (!%p1852_p10), %s250_s18, 32, %s252_s22, [#allocation9]  }
  0x17   : > { %s1754_s11 = smov [#allocation7]   ;;  %s1755_s17 = smov [#allocation10]  }
  0x18   : > { %s236_s14 = sshll.u32 %s1754_s11, 4  ;;  %s262_s18 = sshll.u32 %s1755_s17, 4  ;;  %s237_s14 = int_to_ptr.vmem [resolvable:$true] %s236_s14  ;;  %s263_s18 = int_to_ptr.vmem [resolvable:$true] %s262_s18 }
  0x19   : > { %1421 = dma.hbm_to_vmem [thread:$0]  (!%p1852_p10), %s235_s9, 32, %s237_s14, [#allocation6]  }
  0x1a   : > { %s2594_s19 = smov 128   ;;  %s2595_s20 = smov 8  }
  0x1b   : > { %1427 = dma.hbm_to_vmem [thread:$0]  (!%p1852_p10), %s261_s16, 4096, %s263_s18, [#allocation9], %s2594_s19, %s2594_s19, %s2595_s20  }
  0x1c   : > { %s1878_s21 = sadd.s32 1, %s1748_s27   ;;  %s32_s23 = sadd.s32 1, %s1744_s26 }
  0x1d   : > { %s29_s22 = ssub.s32 %s1748_s27, %s1878_s21  ;;  %p39_p13 = scmp.ne.s32.totalorder %s1744_s26, %s1740_s25 }
  0x1e   : > { %p30_p12 = scmp.eq.s32.totalorder %s29_s22, 0  ;;  %p40_p0 = scmp.eq.s32.totalorder %s1748_s27, 0 }
  0x1f   : > { %p1891_p5 = por %p195_p2, %p39_p13  ;;  %p1440_p7 = scmp.lt.s32.totalorder %s1748_s27, 2 }
  0x20   : > { %s1887_s29 = scalar_select %p30_p12, %s1744_s26, %s32_s23  }
  0x21   : > { %p41_p3 = por %p40_p0, %p39_p13  ;;  %s279_s15 = sand.u32 1, %s1744_s26  }
  0x22   : > { %s1378_s10 = sshll.u32 %s279_s15, 7  ;;  %s1393_s13 = sshll.u32 %s1748_s27, 7 }
  0x23   : > { %s288_s14 = scalar_lea.hbm %s2586_s0, %s1393_s13  ;;  %s283_s17 = scalar_lea.vmem [#allocation2], %s1378_s10 }
  0x24   : > { %s291_s18 = sshll.u32 %s283_s17, 4  ;;  %s289_s22 = sshll.u32 %s288_s14, 4  ;;  %s292_s18 = int_to_ptr.vmem [resolvable:$true] %s291_s18  ;;  %s290_s22 = int_to_ptr.hbm [resolvable:$true] %s289_s22 }
  0x25   : > { %p1901_p9 = pnand %p1440_p7, %p41_p3  ;;  %s280_s19 = scalar_lea.sflag [#allocation3], %s279_s15 }
  0x26   : > { %s1644_s20 = sshra.s32 %s290_s22, 4  ;;  %s1651_s16 = scalar_lea.hbm %s2586_s0, 256  ;;  %s1645_s20 = int_to_ptr.hbm [resolvable:$true] %s1644_s20 }
  0x27   : > { %s1646_s1 = scalar_lea.hbm %s1645_s20, 128  ;;  %p1648_p10 = pneg %p1901_p9 }
  0x28   : > { %p1647_p2 = scmp.ne.s32.totalorder %s1645_s20, %s1646_s1  ;;  %p1652_p0 = scmp.lt.s32.totalorder %s1645_s20, %s2586_s0 }
  0x29   : > { %p1653_p3 = scmp.lt.s32.totalorder %s1651_s16, %s1646_s1 }
  0x2a   : > { %p1649_p12 = pnand %p1648_p10, %p1647_p2 }
  0x2b   : > { %p1654_p7 = por %p1653_p3, %p1652_p0 }
  0x2c   : > { %p1650_p13 = pneg %p1649_p12 }
  0x2e   : > { %p1655_p11 = pnand %p1654_p7, %p1650_p13 }
  0x30   : > { %1658 = shalt.err (!%p1655_p11)
}
  0x31   : > { %s2609_s15 = smov 8   ;;  %s2610_s17 = smov 128  }
  0x32   : > { %1431 = dma.hbm_to_vmem [thread:$0]  (!%p1901_p9), %s290_s22, 2048, %s292_s18, %s280_s19, %s2610_s17, %s2610_s17, %s2609_s15  }
  0x33   : > { %303 = sbr.rel (%p1844_p8) target bundleno = 821 (0x335), region = 48  ;;  %s1921_s13 = sand.u32 (!%p1844_p8), 1, %s1740_s25  }
  0x34   : > { %s1382_s1 = sshll.u32 (!%p1844_p8), %s1921_s13, 7  ;;  %s306_s20 = scalar_lea.sflag (!%p1844_p8), [#allocation3], %s1921_s13 }
  0x35   : > { %s1927_s10 = scalar_lea.vmem (!%p1844_p8), [#allocation2], %s1382_s1 }
  0x38   : > { %1719 = dma.done.wait (%p1831_p4), %s306_s20, 2048  }
  0x39   : > { %1721 = vsyncadd (%p1831_p4), %s306_s20, 4294965248 }
  0x3a   : > { %1723 = dma.done.wait (%p46_p1), [#allocation6], 4128  }
  0x3b   : > { %1725 = vsyncadd (%p46_p1), [#allocation6], 4294963168 }
  0x3c   : > { %1727 = dma.done.wait (%p46_p1), [#allocation9], 4128  }
  0x3d   : > { %1729 = vsyncadd (%p46_p1), [#allocation9], 4294963168  ;;  %v409_v0 = vld [vmem:[#allocation5 + $0xf0] sm:$0xff]  ;;  %v410_v1 = vld [vmem:[#allocation5 + $0xf8] sm:$0xff]  ;;  %s2475_s22 = scalar_lea.vmem [#allocation11], %s1382_s1  ;;  %s1394_s23 = sshll.u32 %s1822_s28, 7 }
  0x3e   : > { %v407_v2 = vld [vmem:[#allocation5 + $0xe0] sm:$0xff]  ;;  %417 = vmatpush.msra.mxu0 %v409_v0  ;;  %482 = vmatpush.msra.mxu1 %v410_v1  ;;  %v408_v3 = vld [vmem:[#allocation5 + $0xe8] sm:$0xff]  ;;  %v405_v4 = vld [vmem:[#allocation5 + $0xd0] sm:$0xff]  ;;  %s1256_s14 = scalar_lea.hbm %s2593_s7, %s1394_s23  ;;  %s1257_s15 = sshll.u32 %s2475_s22, 4  ;;  %s1258_s15 = int_to_ptr.vmem [resolvable:$true] %s1257_s15 }
  0x3f   : > { %v406_v5 = vld [vmem:[#allocation5 + $0xd8] sm:$0xff]  ;;  %v403_v6 = vld [vmem:[#allocation5 + $0xc0] sm:$0xff]  ;;  %v404_v7 = vld [vmem:[#allocation5 + $0xc8] sm:$0xff]  ;;  %s1259_s17 = sshll.u32 %s1256_s14, 4  ;;  %s1245_s1 = scalar_lea.sflag [#allocation4], %s1921_s13  ;;  %s1260_s17 = int_to_ptr.hbm [resolvable:$true] %s1259_s17 }
  0x40   : > { %418 = vmatpush.msra.mxu0 %v407_v2  ;;  %483 = vmatpush.msra.mxu1 %v408_v3  ;;  %v401_v8 = vld [vmem:[#allocation5 + $0xb0] sm:$0xff]  ;;  %v402_v9 = vld [vmem:[#allocation5 + $0xb8] sm:$0xff]  ;;  %v399_v10 = vld [vmem:[#allocation5 + $0xa0] sm:$0xff]  ;;  %s1688_s20 = sshra.s32 %s1260_s17, 4  ;;  %s1694_s12 = scalar_lea.hbm %s2593_s7, 256  ;;  %s1689_s20 = int_to_ptr.hbm [resolvable:$true] %s1688_s20 }
  0x41   : > { %v400_v11 = vld [vmem:[#allocation5 + $0xa8] sm:$0xff]  ;;  %v397_v12 = vld [vmem:[#allocation5 + $0x90] sm:$0xff]  ;;  %v398_v13 = vld [vmem:[#allocation5 + $0x98] sm:$0xff]  ;;  %s1690_s28 = scalar_lea.hbm %s1689_s20, 128  ;;  %p1695_p11 = scmp.lt.s32.totalorder %s1689_s20, %s2593_s7 }
  0x42   : > { %419 = vmatpush.msra.mxu0 %v405_v4  ;;  %484 = vmatpush.msra.mxu1 %v406_v5  ;;  %v395_v14 = vld [vmem:[#allocation5 + $0x80] sm:$0xff]  ;;  %v396_v15 = vld [vmem:[#allocation5 + $0x88] sm:$0xff]  ;;  %v393_v16 = vld [vmem:[#allocation5 + $0x70] sm:$0xff]  ;;  %p1691_p1 = scmp.ne.s32.totalorder %s1689_s20, %s1690_s28  ;;  %p1696_p9 = scmp.lt.s32.totalorder %s1694_s12, %s1690_s28 }
  0x43   : > { %v394_v17 = vld [vmem:[#allocation5 + $0x78] sm:$0xff]  ;;  %v391_v18 = vld [vmem:[#allocation5 + $0x60] sm:$0xff]  ;;  %v392_v19 = vld [vmem:[#allocation5 + $0x68] sm:$0xff] }
  0x44   : > { %420 = vmatpush.msra.mxu0 %v403_v6  ;;  %485 = vmatpush.msra.mxu1 %v404_v7  ;;  %v389_v20 = vld [vmem:[#allocation5 + $0x50] sm:$0xff]  ;;  %v390_v21 = vld [vmem:[#allocation5 + $0x58] sm:$0xff]  ;;  %v387_v22 = vld [vmem:[#allocation5 + $0x40] sm:$0xff]  ;;  %p1692_p4 = pnand %p1691_p1, %p1891_p5  ;;  %p1697_p2 = por %p1696_p9, %p1695_p11 }
  0x45   : > { %v388_v23 = vld [vmem:[#allocation5 + $0x48] sm:$0xff]  ;;  %v385_v24 = vld [vmem:[#allocation5 + $0x30] sm:$0xff]  ;;  %v386_v25 = vld [vmem:[#allocation5 + $0x38] sm:$0xff] }
  0x46   : > { %421 = vmatpush.msra.mxu0 %v401_v8  ;;  %486 = vmatpush.msra.mxu1 %v402_v9  ;;  %v383_v26 = vld [vmem:[#allocation5 + $0x20] sm:$0xff]  ;;  %v384_v27 = vld [vmem:[#allocation5 + $0x28] sm:$0xff]  ;;  %v381_v28 = vld [vmem:[#allocation5 + $0x10] sm:$0xff]  ;;  %p1693_p8 = pneg %p1692_p4 }
  0x47   : > { %v382_v29 = vld [vmem:[#allocation5 + $0x18] sm:$0xff]  ;;  %v379_v30 = vld [vmem:[#allocation5] sm:$0xff]  ;;  %v380_v31 = vld [vmem:[#allocation5 + $0x8] sm:$0xff] }
  0x48   : > { %422 = vmatpush.msra.mxu0 %v399_v10  ;;  %487 = vmatpush.msra.mxu1 %v400_v11  ;;  %v363_v32 = vld [vmem:[%s1927_s10] sm:$0xff]  ;;  %v364_v33 = vld [vmem:[%s1927_s10 + $0x8] sm:$0xff]  ;;  %v365_v34 = vld [vmem:[%s1927_s10 + $0x10] sm:$0xff]  ;;  %p1698_p10 = pnand %p1697_p2, %p1693_p8 }
  0x49   : > { %v366_v35 = vld [vmem:[%s1927_s10 + $0x18] sm:$0xff]  ;;  %v367_v36 = vld [vmem:[%s1927_s10 + $0x20] sm:$0xff]  ;;  %v368_v37 = vld [vmem:[%s1927_s10 + $0x28] sm:$0xff] }
  0x4a   : > { %423 = vmatpush.msra.mxu0 %v397_v12  ;;  %488 = vmatpush.msra.mxu1 %v398_v13  ;;  %v369_v38 = vld [vmem:[%s1927_s10 + $0x30] sm:$0xff]  ;;  %v370_v39 = vld [vmem:[%s1927_s10 + $0x38] sm:$0xff]  ;;  %v371_v40 = vld [vmem:[%s1927_s10 + $0x40] sm:$0xff] }
  0x4b   : > { %v372_v41 = vld [vmem:[%s1927_s10 + $0x48] sm:$0xff]  ;;  %v373_v42 = vld [vmem:[%s1927_s10 + $0x50] sm:$0xff]  ;;  %v411_v43 = vld [vmem:[#allocation7] sm:$0x3] }
  0x4c   : > { %424 = vmatpush.msra.mxu0 %v395_v14  ;;  %489 = vmatpush.msra.mxu1 %v396_v15  ;;  %v374_v44 = vld [vmem:[%s1927_s10 + $0x58] sm:$0xff]  ;;  %v1953_v45 = vperm.slane %v411_v43, 0  ;;  %v1955_v46 = vperm.slane %v411_v43, 1  ;;  %v375_v53 = vld [vmem:[%s1927_s10 + $0x60] sm:$0xff]  ;;  %v376_v61 = vld [vmem:[%s1927_s10 + $0x68] sm:$0xff]  ;;  %v1758_v43 = vmov 256.0  }
  0x4d   : > { %v377_v5 = vld [vmem:[%s1927_s10 + $0x70] sm:$0xff]  ;;  %v378_v13 = vld [vmem:[%s1927_s10 + $0x78] sm:$0xff]  ;;  %1490 = vrcp.f32 %v1758_v43 }
  0x4e   : > { %425 = vmatpush.msra.mxu0 %v393_v16  ;;  %490 = vmatpush.msra.mxu1 %v394_v17 }
  0x50   : > { %426 = vmatpush.msra.mxu0 %v391_v18  ;;  %491 = vmatpush.msra.mxu1 %v392_v19 }
  0x52   : > { %427 = vmatpush.msra.mxu0 %v389_v20  ;;  %492 = vmatpush.msra.mxu1 %v390_v21 }
  0x54   : > { %428 = vmatpush.msra.mxu0 %v387_v22  ;;  %493 = vmatpush.msra.mxu1 %v388_v23 }
  0x56   : > { %429 = vmatpush.msra.mxu0 %v385_v24  ;;  %494 = vmatpush.msra.mxu1 %v386_v25 }
  0x58   : > { %430 = vmatpush.msra.mxu0 %v383_v26  ;;  %495 = vmatpush.msra.mxu1 %v384_v27 }
  0x5a   : > { %431 = vmatpush.msra.mxu0 %v381_v28  ;;  %496 = vmatpush.msra.mxu1 %v382_v29 }
  0x5c   : > { %432 = vmatpush.msra.mxu0 %v379_v30  ;;  %497 = vmatpush.msra.mxu1 %v380_v31 }
  0x5d   : > { %433 = vmatmul.f32.vlgmr.msra.gmra.mxu0 %v363_v32  ;;  %498 = vmatmul.f32.vlgmr.msra.gmra.mxu1 %v363_v32 }
  0x65   : > { %436 = vmatmul.f32.gmra.mxu0 %v364_v33  ;;  %501 = vmatmul.f32.gmra.mxu1 %v364_v33 }
  0x6d   : > { %439 = vmatmul.f32.gmra.mxu0 %v365_v34  ;;  %504 = vmatmul.f32.gmra.mxu1 %v365_v34 }
  0x75   : > { %442 = vmatmul.f32.gmra.mxu0 %v366_v35  ;;  %507 = vmatmul.f32.gmra.mxu1 %v366_v35 }
  0x7d   : > { %445 = vmatmul.f32.gmra.mxu0 %v367_v36  ;;  %510 = vmatmul.f32.gmra.mxu1 %v367_v36 }
  0x85   : > { %448 = vmatmul.f32.gmra.mxu0 %v368_v37  ;;  %513 = vmatmul.f32.gmra.mxu1 %v368_v37 }
  0x8d   : > { %451 = vmatmul.f32.gmra.mxu0 %v369_v38  ;;  %516 = vmatmul.f32.gmra.mxu1 %v369_v38 }
  0x95   : > { %454 = vmatmul.f32.gmra.mxu0 %v370_v39  ;;  %519 = vmatmul.f32.gmra.mxu1 %v370_v39 }
  0x9d   : > { %457 = vmatmul.f32.gmra.mxu0 %v371_v40  ;;  %522 = vmatmul.f32.gmra.mxu1 %v371_v40 }
  0xa5   : > { %460 = vmatmul.f32.gmra.mxu0 %v372_v41  ;;  %525 = vmatmul.f32.gmra.mxu1 %v372_v41 }
  0xad   : > { %463 = vmatmul.f32.gmra.mxu0 %v373_v42  ;;  %528 = vmatmul.f32.gmra.mxu1 %v373_v42 }
  0xb5   : > { %466 = vmatmul.f32.gmra.mxu0 %v374_v44  ;;  %531 = vmatmul.f32.gmra.mxu1 %v374_v44  ;;  %v1491_v44 = vpop.eup %1490 }
  0xb6   : > { %vm632_vm0 = vweird.f32 %v1491_v44 }
  0xbd   : > { %469 = vmatmul.f32.gmra.mxu0 %v375_v53  ;;  %534 = vmatmul.f32.gmra.mxu1 %v375_v53 }
  0xc5   : > { %472 = vmatmul.f32.gmra.mxu0 %v376_v61  ;;  %537 = vmatmul.f32.gmra.mxu1 %v376_v61 }
  0xcd   : > { %475 = vmatmul.f32.gmra.mxu0 %v377_v5  ;;  %540 = vmatmul.f32.gmra.mxu1 %v377_v5 }
  0xd5   : > { %478 = vmatmul.f32.gmra.mxu0 %v378_v13  ;;  %543 = vmatmul.f32.gmra.mxu1 %v378_v13 }
  0xda   : > { %v434_v47 = vpop.f32.mrf.mxu0  ;;  %v499_v48 = vpop.f32.mrf.mxu1 }
  0xdb   : > { %v1958_v49 = vadd.f32 %v434_v47, %v1953_v45  ;;  %v1961_v50 = vadd.f32 %v499_v48, %v1955_v46  ;;  %v628_v47 = vmul.f32 256.0, %v1491_v44 }
  0xdd   : > { %v547_v51 = vmax.f32 %v1958_v49, 0.0  ;;  %v548_v52 = vmax.f32 %v1961_v50, 0.0  ;;  %v629_v48 = vsub.f32 1.0, %v628_v47 }
  0xdf   : > { %v579_v54 = vadd.f32 %v548_v52, %v547_v51 }
  0xe1   : > { %580 = vadd.xlane.f32.xlu0 %v579_v54 }
  0xe2   : > { %v437_v55 = vpop.f32.mrf.mxu0  ;;  %v502_v56 = vpop.f32.mrf.mxu1 }
  0xe3   : > { %v1971_v57 = vadd.f32 %v437_v55, %v1953_v45  ;;  %v1974_v58 = vadd.f32 %v502_v56, %v1955_v46  ;;  %v630_v55 = vmul.f32 %v1491_v44, %v629_v48 }
  0xe5   : > { %v549_v59 = vmax.f32 %v1971_v57, 0.0  ;;  %v550_v60 = vmax.f32 %v1974_v58, 0.0  ;;  %v631_v56 = vadd.f32 %v1491_v44, %v630_v55 }
  0xe7   : > { %v582_v62 = vadd.f32 %v550_v60, %v549_v59 }
  0xe9   : > { %583 = vadd.xlane.f32.xlu0 %v582_v62  ;;  %v2057_v62 = vsel %vm632_vm0, %v1491_v44, %v631_v56 }
  0xea   : > { %v440_v63 = vpop.f32.mrf.mxu0  ;;  %v505_v0 = vpop.f32.mrf.mxu1 }
  0xeb   : > { %v1984_v1 = vadd.f32 %v440_v63, %v1953_v45  ;;  %v1987_v2 = vadd.f32 %v505_v0, %v1955_v46 }
  0xed   : > { %v551_v3 = vmax.f32 %v1984_v1, 0.0  ;;  %v552_v4 = vmax.f32 %v1987_v2, 0.0 }
  0xef   : > { %v585_v6 = vadd.f32 %v552_v4, %v551_v3 }
  0xf1   : > { %586 = vadd.xlane.f32.xlu1 %v585_v6 }
  0xf2   : > { %v443_v7 = vpop.f32.mrf.mxu0  ;;  %v508_v8 = vpop.f32.mrf.mxu1 }
  0xf3   : > { %v1997_v9 = vadd.f32 %v443_v7, %v1953_v45  ;;  %v2000_v10 = vadd.f32 %v508_v8, %v1955_v46 }
  0xf5   : > { %v553_v11 = vmax.f32 %v1997_v9, 0.0  ;;  %v554_v12 = vmax.f32 %v2000_v10, 0.0 }
  0xf7   : > { %v588_v14 = vadd.f32 %v554_v12, %v553_v11 }
  0xf9   : > { %589 = vadd.xlane.f32.xlu1 %v588_v14 }
  0xfa   : > { %v446_v15 = vpop.f32.mrf.mxu0  ;;  %v511_v16 = vpop.f32.mrf.mxu1 }
  0xfb   : > { %v2010_v17 = vadd.f32 %v446_v15, %v1953_v45  ;;  %v2013_v18 = vadd.f32 %v511_v16, %v1955_v46 }
  0xfd   : > { %v555_v19 = vmax.f32 %v2010_v17, 0.0  ;;  %v556_v20 = vmax.f32 %v2013_v18, 0.0 }
  0xff   : > { %v591_v21 = vadd.f32 %v556_v20, %v555_v19 }
 0x101   : > { %592 = vadd.xlane.f32.xlu2 %v591_v21 }
 0x102   : > { %v449_v22 = vpop.f32.mrf.mxu0  ;;  %v514_v23 = vpop.f32.mrf.mxu1 }
 0x103   : > { %v2022_v24 = vadd.f32 %v449_v22, %v1953_v45  ;;  %v2025_v25 = vadd.f32 %v514_v23, %v1955_v46 }
 0x105   : > { %v557_v26 = vmax.f32 %v2022_v24, 0.0  ;;  %v558_v27 = vmax.f32 %v2025_v25, 0.0 }
 0x107   : > { %v594_v28 = vadd.f32 %v558_v27, %v557_v26 }
 0x109   : > { %595 = vadd.xlane.f32.xlu2 %v594_v28 }
 0x10a   : > { %v452_v29 = vpop.f32.mrf.mxu0  ;;  %v517_v30 = vpop.f32.mrf.mxu1 }
 0x10b   : > { %v2034_v31 = vadd.f32 %v452_v29, %v1953_v45  ;;  %v2037_v32 = vadd.f32 %v517_v30, %v1955_v46 }
 0x10d   : > { %v559_v33 = vmax.f32 %v2034_v31, 0.0  ;;  %v560_v34 = vmax.f32 %v2037_v32, 0.0 }
 0x10f   : > { %v597_v35 = vadd.f32 %v560_v34, %v559_v33 }
 0x111   : > { %598 = vadd.xlane.f32.xlu0 %v597_v35 }
 0x112   : > { %v455_v36 = vpop.f32.mrf.mxu0  ;;  %v520_v37 = vpop.f32.mrf.mxu1 }
 0x113   : > { %v2046_v38 = vadd.f32 %v455_v36, %v1953_v45  ;;  %v2049_v39 = vadd.f32 %v520_v37, %v1955_v46 }
 0x115   : > { %v561_v40 = vmax.f32 %v2046_v38, 0.0  ;;  %v562_v41 = vmax.f32 %v2049_v39, 0.0 }
 0x117   : > { %v600_v42 = vadd.f32 %v562_v41, %v561_v40 }
 0x119   : > { %601 = vadd.xlane.f32.xlu2 %v600_v42 }
 0x11a   : > { %v458_v53 = vpop.f32.mrf.mxu0  ;;  %v523_v54 = vpop.f32.mrf.mxu1 }
 0x11b   : > { %v2069_v8 = vadd.f32 %v458_v53, %v1953_v45  ;;  %v2072_v13 = vadd.f32 %v523_v54, %v1955_v46 }
 0x11d   : > { %v563_v21 = vmax.f32 %v2069_v8, 0.0  ;;  %v564_v50 = vmax.f32 %v2072_v13, 0.0 }
 0x11f   : > { %v603_v29 = vadd.f32 %v564_v50, %v563_v21 }
 0x122   : > { %v461_v61 = vpop.f32.mrf.mxu0  ;;  %v526_v63 = vpop.f32.mrf.mxu1 }
 0x123   : > { %v2098_v36 = vadd.f32 %v461_v61, %v1953_v45  ;;  %v2101_v57 = vadd.f32 %v526_v63, %v1955_v46 }
 0x125   : > { %v565_v37 = vmax.f32 %v2098_v36, 0.0  ;;  %v566_v42 = vmax.f32 %v2101_v57, 0.0 }
 0x127   : > { %v606_v1 = vadd.f32 %v566_v42, %v565_v37 }
 0x12a   : > { %v464_v49 = vpop.f32.mrf.mxu0 }
 0x12b   : > { %v2115_v53 = vadd.f32 %v464_v49, %v1953_v45 }
 0x132   : > { %v467_v43 = vpop.f32.mrf.mxu0 }
 0x133   : > { %v2148_v9 = vadd.f32 %v467_v43, %v1953_v45 }
 0x154   : > { %v581_v0 = vpop.xlane.xlu0 %580 }
 0x155   : > { %v634_v5 = vmul.f32 %v2057_v62, %v581_v0 }
 0x157   : > { %v2062_v6 = vsub.f32 %v547_v51, %v634_v5  ;;  %v2066_v7 = vsub.f32 %v548_v52, %v634_v5  ;;  %v529_v52 = vpop.f32.mrf.mxu1 }
 0x158   : > { %v2118_v54 = vadd.f32 %v529_v52, %v1955_v46 }
 0x159   : > { %v682_v14 = vmul.f32 %v2062_v6, %v2062_v6  ;;  %v683_v15 = vmul.f32 %v2066_v7, %v2066_v7 }
 0x15a   : > { %v568_v61 = vmax.f32 %v2118_v54, 0.0 }
 0x15b   : > { %v714_v16 = vadd.f32 %v683_v15, %v682_v14  ;;  %v470_v14 = vpop.f32.mrf.mxu0 }
 0x15c   : > { %v584_v51 = vpop.xlane.xlu0 %583 }
 0x15d   : > { %v635_v22 = vmul.f32 %v2057_v62, %v584_v51  ;;  %715 = vadd.xlane.f32.xlu1 %v714_v16 }
 0x15f   : > { %v2083_v23 = vsub.f32 %v549_v59, %v635_v22  ;;  %v2087_v28 = vsub.f32 %v550_v60, %v635_v22  ;;  %v532_v44 = vpop.f32.mrf.mxu1  ;;  %v569_v22 = vmax.f32 %v2148_v9, 0.0 }
 0x160   : > { %v2151_v10 = vadd.f32 %v532_v44, %v1955_v46 }
 0x161   : > { %v684_v30 = vmul.f32 %v2083_v23, %v2083_v23  ;;  %v685_v35 = vmul.f32 %v2087_v28, %v2087_v28 }
 0x163   : > { %v717_v58 = vadd.f32 %v685_v35, %v684_v30  ;;  %v473_v18 = vpop.f32.mrf.mxu0 }
 0x164   : > { %v587_v59 = vpop.xlane.xlu1 %586  ;;  %v2198_v24 = vadd.f32 %v473_v18, %v1953_v45 }
 0x165   : > { %v636_v60 = vmul.f32 %v2057_v62, %v587_v59  ;;  %604 = vadd.xlane.f32.xlu1 %v603_v29  ;;  %718 = vadd.xlane.f32.xlu0 %v717_v58  ;;  %v570_v29 = vmax.f32 %v2151_v10, 0.0  ;;  %v2165_v58 = vadd.f32 %v470_v14, %v1953_v45  ;;  %v1092_v14 = vld [vmem:[#allocation10 + $0xf0] sm:$0xff] }
 0x167   : > { %v2108_v47 = vsub.f32 %v551_v3, %v636_v60  ;;  %v2112_v48 = vsub.f32 %v552_v4, %v636_v60  ;;  %v567_v4 = vmax.f32 %v2115_v53, 0.0  ;;  %v535_v16 = vpop.f32.mrf.mxu1  ;;  %v612_v60 = vadd.f32 %v570_v29, %v569_v22 }
 0x168   : > { %v2168_v59 = vadd.f32 %v535_v16, %v1955_v46 }
 0x169   : > { %v686_v55 = vmul.f32 %v2108_v47, %v2108_v47  ;;  %v687_v56 = vmul.f32 %v2112_v48, %v2112_v48  ;;  %v609_v15 = vadd.f32 %v568_v61, %v567_v4 }
 0x16b   : > { %v720_v2 = vadd.f32 %v687_v56, %v686_v55  ;;  %v571_v55 = vmax.f32 %v2165_v58, 0.0  ;;  %v572_v56 = vmax.f32 %v2168_v59, 0.0 }
 0x16c   : > { %v590_v3 = vpop.xlane.xlu1 %589 }
 0x16d   : > { %v637_v63 = vmul.f32 %v2057_v62, %v590_v3  ;;  %721 = vadd.xlane.f32.xlu2 %v720_v2  ;;  %607 = vadd.xlane.f32.xlu0 %v606_v1  ;;  %v1077_v2 = vld [vmem:[#allocation10 + $0x78] sm:$0xff] }
 0x16e   : > { %v1093_v3 = vld [vmem:[#allocation10 + $0xf8] sm:$0xff]  ;;  %1098 = vmatpush.msra.mxu2 %v1077_v2 }
 0x16f   : > { %v2133_v0 = vsub.f32 %v553_v11, %v637_v63  ;;  %v2137_v5 = vsub.f32 %v554_v12, %v637_v63  ;;  %v1076_v63 = vld [vmem:[#allocation10 + $0x70] sm:$0xff]  ;;  %1163 = vmatpush.msra.mxu3 %v1093_v3 }
 0x170   : > { %1099 = vmatpush.msra.mxu2 %v1076_v63 }
 0x171   : > { %v688_v49 = vmul.f32 %v2133_v0, %v2133_v0  ;;  %v689_v51 = vmul.f32 %v2137_v5, %v2137_v5  ;;  %1164 = vmatpush.msra.mxu3 %v1092_v14 }
 0x173   : > { %v723_v11 = vadd.f32 %v689_v51, %v688_v49  ;;  %v615_v49 = vadd.f32 %v572_v56, %v571_v55 }
 0x174   : > { %v593_v12 = vpop.xlane.xlu2 %592 }
 0x175   : > { %v638_v52 = vmul.f32 %v2057_v62, %v593_v12  ;;  %610 = vadd.xlane.f32.xlu2 %v609_v15  ;;  %724 = vadd.xlane.f32.xlu1 %v723_v11 }
 0x177   : > { %v2158_v30 = vsub.f32 %v555_v19, %v638_v52  ;;  %v2162_v35 = vsub.f32 %v556_v20, %v638_v52  ;;  %v538_v20 = vpop.f32.mrf.mxu1 }
 0x178   : > { %v2201_v25 = vadd.f32 %v538_v20, %v1955_v46 }
 0x179   : > { %v690_v17 = vmul.f32 %v2158_v30, %v2158_v30  ;;  %v691_v19 = vmul.f32 %v2162_v35, %v2162_v35 }
 0x17b   : > { %v726_v43 = vadd.f32 %v691_v19, %v690_v17  ;;  %v573_v17 = vmax.f32 %v2198_v24, 0.0  ;;  %v2600_v19 = vmax.f32 %v2201_v25, 0.0 }
 0x17c   : > { %v596_v44 = vpop.xlane.xlu2 %595 }
 0x17d   : > { %v639_v1 = vmul.f32 %v2057_v62, %v596_v44  ;;  %613 = vadd.xlane.f32.xlu1 %v612_v60  ;;  %727 = vadd.xlane.f32.xlu0 %v726_v43 }
 0x17f   : > { %v2183_v15 = vsub.f32 %v557_v26, %v639_v1  ;;  %v2187_v16 = vsub.f32 %v558_v27, %v639_v1  ;;  %v476_v27 = vpop.f32.mrf.mxu0  ;;  %v541_v52 = vpop.f32.mrf.mxu1  ;;  %v618_v1 = vadd.f32 %v2600_v19, %v573_v17 }
 0x180   : > { %v2215_v20 = vadd.f32 %v476_v27, %v1953_v45  ;;  %v2218_v44 = vadd.f32 %v541_v52, %v1955_v46 }
 0x181   : > { %v692_v51 = vmul.f32 %v2183_v15, %v2183_v15  ;;  %v693_v11 = vmul.f32 %v2187_v16, %v2187_v16 }
 0x182   : > { %v2599_v2 = vmax.f32 %v2215_v20, 0.0  ;;  %v2598_v3 = vmax.f32 %v2218_v44, 0.0 }
 0x183   : > { %v729_v26 = vadd.f32 %v693_v11, %v692_v51 }
 0x184   : > { %v599_v12 = vpop.xlane.xlu0 %598 }
 0x185   : > { %v640_v60 = vmul.f32 %v2057_v62, %v599_v12  ;;  %730 = vadd.xlane.f32.xlu2 %v729_v26  ;;  %616 = vadd.xlane.f32.xlu0 %v615_v49  ;;  %v621_v26 = vadd.f32 %v2598_v3, %v2599_v2 }
 0x187   : > { %v2208_v43 = vsub.f32 %v559_v33, %v640_v60  ;;  %v2212_v18 = vsub.f32 %v560_v34, %v640_v60  ;;  %v479_v14 = vpop.f32.mrf.mxu0  ;;  %v544_v49 = vpop.f32.mrf.mxu1 }
 0x188   : > { %v2248_v52 = vadd.f32 %v479_v14, %v1953_v45  ;;  %v2251_v38 = vadd.f32 %v544_v49, %v1955_v46  ;;  %v1074_v45 = vld [vmem:[#allocation10 + $0x60] sm:$0xff]  ;;  %v1071_v14 = vld [vmem:[#allocation10 + $0x48] sm:$0xff] }
 0x189   : > { %v694_v31 = vmul.f32 %v2208_v43, %v2208_v43  ;;  %v695_v33 = vmul.f32 %v2212_v18, %v2212_v18  ;;  %v1090_v46 = vld [vmem:[#allocation10 + $0xe0] sm:$0xff]  ;;  %v1087_v49 = vld [vmem:[#allocation10 + $0xc8] sm:$0xff] }
 0x18b   : > { %v732_v32 = vadd.f32 %v695_v33, %v694_v31  ;;  %v1091_v31 = vld [vmem:[#allocation10 + $0xe8] sm:$0xff]  ;;  %v1073_v33 = vld [vmem:[#allocation10 + $0x58] sm:$0xff] }
 0x18c   : > { %v602_v34 = vpop.xlane.xlu2 %601  ;;  %1165 = vmatpush.msra.mxu3 %v1091_v31  ;;  %v1067_v31 = vld [vmem:[#allocation10 + $0x28] sm:$0xff] }
 0x18d   : > { %v641_v63 = vmul.f32 %v2057_v62, %v602_v34  ;;  %619 = vadd.xlane.f32.xlu2 %v618_v1  ;;  %733 = vadd.xlane.f32.xlu1 %v732_v32  ;;  %v1075_v1 = vld [vmem:[#allocation10 + $0x68] sm:$0xff]  ;;  %v1089_v32 = vld [vmem:[#allocation10 + $0xd8] sm:$0xff]  ;;  %v1072_v34 = vld [vmem:[#allocation10 + $0x50] sm:$0xff] }
 0x18e   : > { %1100 = vmatpush.msra.mxu2 %v1075_v1  ;;  %1166 = vmatpush.msra.mxu3 %v1090_v46  ;;  %v1084_v1 = vld [vmem:[#allocation10 + $0xb0] sm:$0xff]  ;;  %v1066_v46 = vld [vmem:[#allocation10 + $0x20] sm:$0xff] }
 0x18f   : > { %v2233_v51 = vsub.f32 %v561_v40, %v641_v63  ;;  %v2237_v11 = vsub.f32 %v562_v41, %v641_v63  ;;  %v2597_v40 = vmax.f32 %v2248_v52, 0.0  ;;  %v2596_v41 = vmax.f32 %v2251_v38, 0.0  ;;  %v1088_v63 = vld [vmem:[#allocation10 + $0xd0] sm:$0xff] }
 0x190   : > { %1101 = vmatpush.msra.mxu2 %v1074_v45  ;;  %1167 = vmatpush.msra.mxu3 %v1089_v32  ;;  %v1083_v45 = vld [vmem:[#allocation10 + $0xa8] sm:$0xff]  ;;  %v1065_v32 = vld [vmem:[#allocation10 + $0x18] sm:$0xff] }
 0x191   : > { %v696_v27 = vmul.f32 %v2233_v51, %v2233_v51  ;;  %v697_v12 = vmul.f32 %v2237_v11, %v2237_v11  ;;  %v624_v60 = vadd.f32 %v2596_v41, %v2597_v40 }
 0x192   : > { %1102 = vmatpush.msra.mxu2 %v1073_v33  ;;  %1168 = vmatpush.msra.mxu3 %v1088_v63  ;;  %v1082_v33 = vld [vmem:[#allocation10 + $0xa0] sm:$0xff]  ;;  %v1064_v63 = vld [vmem:[#allocation10 + $0x10] sm:$0xff] }
 0x193   : > { %v735_v39 = vadd.f32 %v697_v12, %v696_v27  ;;  %v1086_v27 = vld [vmem:[#allocation10 + $0xc0] sm:$0xff]  ;;  %v1069_v12 = vld [vmem:[#allocation10 + $0x38] sm:$0xff] }
 0x194   : > { %1103 = vmatpush.msra.mxu2 %v1072_v34  ;;  %1169 = vmatpush.msra.mxu3 %v1087_v49  ;;  %v1081_v34 = vld [vmem:[#allocation10 + $0x98] sm:$0xff]  ;;  %v1063_v49 = vld [vmem:[#allocation10 + $0x8] sm:$0xff] }
 0x195   : > { %736 = vadd.xlane.f32.xlu0 %v735_v39  ;;  %622 = vadd.xlane.f32.xlu1 %v621_v26  ;;  %v1070_v26 = vld [vmem:[#allocation10 + $0x40] sm:$0xff]  ;;  %v1085_v39 = vld [vmem:[#allocation10 + $0xb8] sm:$0xff] }
 0x196   : > { %1104 = vmatpush.msra.mxu2 %v1071_v14  ;;  %1170 = vmatpush.msra.mxu3 %v1086_v27  ;;  %v1080_v14 = vld [vmem:[#allocation10 + $0x90] sm:$0xff]  ;;  %v1062_v27 = vld [vmem:[#allocation10] sm:$0xff] }
 0x198   : > { %1105 = vmatpush.msra.mxu2 %v1070_v26  ;;  %1171 = vmatpush.msra.mxu3 %v1085_v39  ;;  %v1079_v26 = vld [vmem:[#allocation10 + $0x88] sm:$0xff] }
 0x19a   : > { %1106 = vmatpush.msra.mxu2 %v1069_v12  ;;  %1172 = vmatpush.msra.mxu3 %v1084_v1  ;;  %v1078_v12 = vld [vmem:[#allocation10 + $0x80] sm:$0xff] }
 0x19c   : > { %1173 = vmatpush.msra.mxu3 %v1083_v45 }
 0x19d   : > { %625 = vadd.xlane.f32.xlu0 %v624_v60  ;;  %v1068_v60 = vld [vmem:[#allocation10 + $0x30] sm:$0xff] }
 0x19e   : > { %1107 = vmatpush.msra.mxu2 %v1068_v60  ;;  %1174 = vmatpush.msra.mxu3 %v1082_v33 }
 0x1a0   : > { %1108 = vmatpush.msra.mxu2 %v1067_v31  ;;  %1175 = vmatpush.msra.mxu3 %v1081_v34 }
 0x1a2   : > { %1109 = vmatpush.msra.mxu2 %v1066_v46  ;;  %1176 = vmatpush.msra.mxu3 %v1080_v14 }
 0x1a4   : > { %1110 = vmatpush.msra.mxu2 %v1065_v32  ;;  %1177 = vmatpush.msra.mxu3 %v1079_v26 }
 0x1a6   : > { %1111 = vmatpush.msra.mxu2 %v1064_v63  ;;  %1178 = vmatpush.msra.mxu3 %v1078_v12 }
 0x1a8   : > { %1112 = vmatpush.msra.mxu2 %v1063_v49 }
 0x1aa   : > { %1113 = vmatpush.msra.mxu2 %v1062_v27 }
 0x1d0   : > { %v716_v39 = vpop.xlane.xlu1 %715 }
 0x1d1   : > { %v762_v60 = vmul.f32 %v716_v39, %v2057_v62 }
 0x1d3   : > { %v778_v1 = vadd.f32 1e-05, %v762_v60 }
 0x1d5   : > { %1492 = vrsqrt.f32 %v778_v1  ;;  %vm800_vm2 = vweird.f32 %v778_v1 }
 0x1d8   : > { %v605_v31 = vpop.xlane.xlu1 %604  ;;  %v719_v45 = vpop.xlane.xlu0 %718 }
 0x1d9   : > { %v642_v46 = vmul.f32 %v2057_v62, %v605_v31  ;;  %v763_v33 = vmul.f32 %v719_v45, %v2057_v62 }
 0x1db   : > { %v1493_v32 = vpop.eup %1492  ;;  %v2264_v34 = vsub.f32 %v563_v21, %v642_v46  ;;  %v2268_v63 = vsub.f32 %v564_v50, %v642_v46  ;;  %v779_v14 = vadd.f32 1e-05, %v763_v33  ;;  %v986_v50 = vld [vmem:[%s2589_s3] sm:$0x3] }
 0x1dc   : > { %v795_v49 = vmul.f32 %v1493_v32, %v778_v1  ;;  %vm801_vm1 = vweird.f32 %v1493_v32 }
 0x1dd   : > { %1494 = vrsqrt.f32 %v779_v14  ;;  %v698_v26 = vmul.f32 %v2264_v34, %v2264_v34  ;;  %v699_v27 = vmul.f32 %v2268_v63, %v2268_v63  ;;  %vm802_vm3 = vmor %vm800_vm2, %vm801_vm1  ;;  %vm810_vm5 = vweird.f32 %v779_v14 }
 0x1de   : > { %v796_v12 = vmul.f32 %v1493_v32, %v795_v49 }
 0x1df   : > { %v738_v39 = vadd.f32 %v699_v27, %v698_v26 }
 0x1e0   : > { %v797_v60 = vmul.f32 0.5, %v796_v12  ;;  %v722_v31 = vpop.xlane.xlu2 %721  ;;  %v608_v8 = vpop.xlane.xlu0 %607 }
 0x1e1   : > { %v764_v21 = vmul.f32 %v722_v31, %v2057_v62  ;;  %v643_v13 = vmul.f32 %v2057_v62, %v608_v8  ;;  %739 = vadd.xlane.f32.xlu2 %v738_v39  ;;  %v2289_v39 = vperm.slane %v986_v50, 0  ;;  %v1024_v31 = vld [vmem:[#allocation8] sm:$0x3] }
 0x1e2   : > { %v798_v45 = vsub.f32 1.5, %v797_v60  ;;  %v2302_v3 = vperm.slane %v1024_v31, 1 }
 0x1e3   : > { %v1495_v46 = vpop.eup %1494  ;;  %v2279_v33 = vadd.f32 1e-05, %v764_v21  ;;  %v2283_v49 = vsub.f32 %v565_v37, %v643_v13  ;;  %v2287_v26 = vsub.f32 %v566_v42, %v643_v13  ;;  %v2296_v37 = vperm.slane %v986_v50, 1 }
 0x1e4   : > { %v799_v27 = vmul.f32 %v1493_v32, %v798_v45  ;;  %v805_v12 = vmul.f32 %v1495_v46, %v779_v14  ;;  %v2299_v21 = vperm.slane %v1024_v31, 0  ;;  %vm811_vm4 = vweird.f32 %v1495_v46 }
 0x1e5   : > { %1496 = vrsqrt.f32 %v2279_v33  ;;  %v700_v60 = vmul.f32 %v2283_v49, %v2283_v49  ;;  %v701_v36 = vmul.f32 %v2287_v26, %v2287_v26  ;;  %vm812_vm6 = vmor %vm810_vm5, %vm811_vm4  ;;  %vm820_vm8 = vweird.f32 %v2279_v33 }
 0x1e6   : > { %v806_v57 = vmul.f32 %v1495_v46, %v805_v12  ;;  %v803_v42 = vsel %vm802_vm3, %v1493_v32, %v799_v27 }
 0x1e7   : > { %v741_v8 = vadd.f32 %v701_v36, %v700_v60  ;;  %v954_v1 = vmul.f32 %v803_v42, %v2062_v6  ;;  %v955_v13 = vmul.f32 %v803_v42, %v2066_v7 }
 0x1e8   : > { %v807_v45 = vmul.f32 0.5, %v806_v57  ;;  %v611_v41 = vpop.xlane.xlu2 %610  ;;  %v725_v40 = vpop.xlane.xlu1 %724 }
 0x1e9   : > { %v644_v2 = vmul.f32 %v2057_v62, %v611_v41  ;;  %v765_v19 = vmul.f32 %v725_v40, %v2057_v62  ;;  %742 = vadd.xlane.f32.xlu1 %v741_v8  ;;  %v992_v50 = vmul.f32 %v2289_v39, %v954_v1  ;;  %v993_v32 = vmul.f32 %v2296_v37, %v955_v13 }
 0x1ea   : > { %v808_v27 = vsub.f32 1.5, %v807_v45 }
 0x1eb   : > { %v1497_v6 = vpop.eup %1496  ;;  %v2310_v7 = vsub.f32 %v567_v4, %v644_v2  ;;  %v2314_v12 = vsub.f32 %v568_v61, %v644_v2  ;;  %v2316_v31 = vadd.f32 1e-05, %v765_v19  ;;  %v1030_v40 = vadd.f32 %v2299_v21, %v992_v50 }
 0x1ec   : > { %v809_v41 = vmul.f32 %v1495_v46, %v808_v27  ;;  %v815_v60 = vmul.f32 %v1497_v6, %v2279_v33  ;;  %v1031_v36 = vadd.f32 %v2302_v3, %v993_v32  ;;  %vm821_vm7 = vweird.f32 %v1497_v6 }
 0x1ed   : > { %1498 = vrsqrt.f32 %v2316_v31  ;;  %1114 = vmatmul.f32.vlgmr.msra.gmra.mxu2 %v1030_v40  ;;  %v702_v53 = vmul.f32 %v2310_v7, %v2310_v7  ;;  %v703_v54 = vmul.f32 %v2314_v12, %v2314_v12  ;;  %vm822_vm9 = vmor %vm820_vm8, %vm821_vm7  ;;  %vm830_vm11 = vweird.f32 %v2316_v31 }
 0x1ee   : > { %v816_v4 = vmul.f32 %v1497_v6, %v815_v60  ;;  %1179 = vmatmul.f32.vlgmr.msra.gmra.mxu3 %v1031_v36  ;;  %v813_v61 = vsel %vm812_vm6, %v1495_v46, %v809_v41 }
 0x1ef   : > { %v744_v19 = vadd.f32 %v703_v54, %v702_v53  ;;  %v956_v2 = vmul.f32 %v813_v61, %v2083_v23  ;;  %v957_v14 = vmul.f32 %v813_v61, %v2087_v28 }
 0x1f0   : > { %v817_v57 = vmul.f32 0.5, %v816_v4  ;;  %v614_v42 = vpop.xlane.xlu1 %613  ;;  %v728_v8 = vpop.xlane.xlu0 %727 }
 0x1f1   : > { %v645_v1 = vmul.f32 %v2057_v62, %v614_v42  ;;  %v766_v13 = vmul.f32 %v728_v8, %v2057_v62  ;;  %745 = vadd.xlane.f32.xlu2 %v744_v19  ;;  %v994_v45 = vmul.f32 %v2289_v39, %v956_v2  ;;  %v995_v50 = vmul.f32 %v2296_v37, %v957_v14 }
 0x1f2   : > { %v818_v32 = vsub.f32 1.5, %v817_v57 }
 0x1f3   : > { %v1499_v46 = vpop.eup %1498  ;;  %v2334_v23 = vsub.f32 %v569_v22, %v645_v1  ;;  %v2338_v28 = vsub.f32 %v570_v29, %v645_v1  ;;  %v2340_v27 = vadd.f32 1e-05, %v766_v13  ;;  %v1032_v40 = vadd.f32 %v2299_v21, %v994_v45 }
 0x1f4   : > { %v819_v41 = vmul.f32 %v1497_v6, %v818_v32  ;;  %v825_v60 = vmul.f32 %v1499_v46, %v2316_v31  ;;  %v1033_v36 = vadd.f32 %v2302_v3, %v995_v50  ;;  %vm831_vm10 = vweird.f32 %v1499_v46 }
 0x1f5   : > { %1500 = vrsqrt.f32 %v2340_v27  ;;  %1117 = vmatmul.f32.gmra.mxu2 %v1032_v40  ;;  %v704_v9 = vmul.f32 %v2334_v23, %v2334_v23  ;;  %v705_v10 = vmul.f32 %v2338_v28, %v2338_v28  ;;  %vm832_vm12 = vmor %vm830_vm11, %vm831_vm10  ;;  %vm840_vm14 = vweird.f32 %v2340_v27 }
 0x1f6   : > { %v826_v22 = vmul.f32 %v1499_v46, %v825_v60  ;;  %1182 = vmatmul.f32.gmra.mxu3 %v1033_v36  ;;  %v823_v29 = vsel %vm822_vm9, %v1497_v6, %v819_v41 }
 0x1f7   : > { %v747_v53 = vadd.f32 %v705_v10, %v704_v9  ;;  %v958_v33 = vmul.f32 %v823_v29, %v2108_v47  ;;  %v959_v54 = vmul.f32 %v823_v29, %v2112_v48 }
 0x1f8   : > { %v827_v4 = vmul.f32 0.5, %v826_v22  ;;  %v731_v61 = vpop.xlane.xlu2 %730  ;;  %v617_v19 = vpop.xlane.xlu0 %616 }
 0x1f9   : > { %v767_v2 = vmul.f32 %v731_v61, %v2057_v62  ;;  %v646_v14 = vmul.f32 %v2057_v62, %v617_v19  ;;  %748 = vadd.xlane.f32.xlu0 %v747_v53  ;;  %v996_v57 = vmul.f32 %v2289_v39, %v958_v33  ;;  %v997_v42 = vmul.f32 %v2296_v37, %v959_v54 }
 0x1fa   : > { %v828_v8 = vsub.f32 1.5, %v827_v4 }
 0x1fb   : > { %v1501_v6 = vpop.eup %1500  ;;  %v2357_v1 = vadd.f32 1e-05, %v767_v2  ;;  %v2361_v47 = vsub.f32 %v571_v55, %v646_v14  ;;  %v2365_v48 = vsub.f32 %v572_v56, %v646_v14  ;;  %v1034_v13 = vadd.f32 %v2299_v21, %v996_v57 }
 0x1fc   : > { %v829_v45 = vmul.f32 %v1499_v46, %v828_v8  ;;  %v835_v50 = vmul.f32 %v1501_v6, %v2340_v27  ;;  %v1035_v32 = vadd.f32 %v2302_v3, %v997_v42  ;;  %vm841_vm13 = vweird.f32 %v1501_v6 }
 0x1fd   : > { %1502 = vrsqrt.f32 %v2357_v1  ;;  %1120 = vmatmul.f32.gmra.mxu2 %v1034_v13  ;;  %v706_v58 = vmul.f32 %v2361_v47, %v2361_v47  ;;  %v707_v59 = vmul.f32 %v2365_v48, %v2365_v48  ;;  %vm842_vm15 = vmor %vm840_vm14, %vm841_vm13  ;;  %vm850_vm1 = vweird.f32 %v2357_v1 }
 0x1fe   : > { %v836_v55 = vmul.f32 %v1501_v6, %v835_v50  ;;  %1185 = vmatmul.f32.gmra.mxu3 %v1035_v32  ;;  %v833_v56 = vsel %vm832_vm12, %v1499_v46, %v829_v45 }
 0x1ff   : > { %v750_v40 = vadd.f32 %v707_v59, %v706_v58  ;;  %v960_v31 = vmul.f32 %v833_v56, %v2133_v0  ;;  %v961_v41 = vmul.f32 %v833_v56, %v2137_v5  ;;  %v2611_v5 = vmax.f32 %v2201_v25, 0.0 }
 0x200   : > { %v837_v60 = vmul.f32 0.5, %v836_v55  ;;  %v620_v36 = vpop.xlane.xlu2 %619  ;;  %v734_v9 = vpop.xlane.xlu1 %733 }
 0x201   : > { %v647_v10 = vmul.f32 %v2057_v62, %v620_v36  ;;  %v768_v22 = vmul.f32 %v734_v9, %v2057_v62  ;;  %751 = vadd.xlane.f32.xlu1 %v750_v40  ;;  %v998_v29 = vmul.f32 %v2289_v39, %v960_v31  ;;  %v999_v53 = vmul.f32 %v2296_v37, %v961_v41 }
 0x202   : > { %v838_v33 = vsub.f32 1.5, %v837_v60  ;;  %v2612_v40 = vmax.f32 %v2215_v20, 0.0 }
 0x203   : > { %v1503_v46 = vpop.eup %1502  ;;  %v2384_v0 = vsub.f32 %v573_v17, %v647_v10  ;;  %v2388_v54 = vsub.f32 %v2611_v5, %v647_v10  ;;  %v2390_v4 = vadd.f32 1e-05, %v768_v22  ;;  %v1036_v61 = vadd.f32 %v2299_v21, %v998_v29 }
 0x204   : > { %v839_v19 = vmul.f32 %v1501_v6, %v838_v33  ;;  %v845_v2 = vmul.f32 %v1503_v46, %v2357_v1  ;;  %v1037_v14 = vadd.f32 %v2302_v3, %v999_v53  ;;  %vm851_vm0 = vweird.f32 %v1503_v46 }
 0x205   : > { %1504 = vrsqrt.f32 %v2390_v4  ;;  %1123 = vmatmul.f32.gmra.mxu2 %v1036_v61  ;;  %v708_v24 = vmul.f32 %v2384_v0, %v2384_v0  ;;  %v709_v25 = vmul.f32 %v2388_v54, %v2388_v54  ;;  %vm852_vm2 = vmor %vm850_vm1, %vm851_vm0  ;;  %vm860_vm4 = vweird.f32 %v2390_v4 }
 0x206   : > { %v846_v17 = vmul.f32 %v1503_v46, %v845_v2  ;;  %1188 = vmatmul.f32.gmra.mxu3 %v1037_v14  ;;  %v843_v57 = vsel %vm842_vm15, %v1501_v6, %v839_v19 }
 0x207   : > { %v753_v42 = vadd.f32 %v709_v25, %v708_v24  ;;  %v962_v27 = vmul.f32 %v843_v57, %v2158_v30  ;;  %v963_v8 = vmul.f32 %v843_v57, %v2162_v35  ;;  %v2613_v35 = vmax.f32 %v2218_v44, 0.0 }
 0x208   : > { %v847_v13 = vmul.f32 0.5, %v846_v17  ;;  %v623_v45 = vpop.xlane.xlu1 %622  ;;  %v737_v50 = vpop.xlane.xlu0 %736  ;;  %v2614_v17 = vmax.f32 %v2248_v52, 0.0 }
 0x209   : > { %v648_v32 = vmul.f32 %v2057_v62, %v623_v45  ;;  %v769_v58 = vmul.f32 %v737_v50, %v2057_v62  ;;  %754 = vadd.xlane.f32.xlu2 %v753_v42  ;;  %v1000_v59 = vmul.f32 %v2289_v39, %v962_v27  ;;  %v1001_v55 = vmul.f32 %v2296_v37, %v963_v8 }
 0x20a   : > { %v848_v56 = vsub.f32 1.5, %v847_v13 }
 0x20b   : > { %v1505_v6 = vpop.eup %1504  ;;  %v2409_v30 = vsub.f32 %v2612_v40, %v648_v32  ;;  %v2413_v31 = vsub.f32 %v2613_v35, %v648_v32  ;;  %v785_v41 = vadd.f32 1e-05, %v769_v58  ;;  %v1038_v60 = vadd.f32 %v2299_v21, %v1000_v59 }
 0x20c   : > { %v849_v36 = vmul.f32 %v1503_v46, %v848_v56  ;;  %v855_v9 = vmul.f32 %v1505_v6, %v2390_v4  ;;  %v1039_v10 = vadd.f32 %v2302_v3, %v1001_v55  ;;  %vm861_vm3 = vweird.f32 %v1505_v6 }
 0x20d   : > { %1506 = vrsqrt.f32 %v785_v41  ;;  %1126 = vmatmul.f32.gmra.mxu2 %v1038_v60  ;;  %v710_v20 = vmul.f32 %v2409_v30, %v2409_v30  ;;  %v711_v44 = vmul.f32 %v2413_v31, %v2413_v31  ;;  %vm862_vm5 = vmor %vm860_vm4, %vm861_vm3  ;;  %vm870_vm7 = vweird.f32 %v785_v41 }
 0x20e   : > { %v856_v22 = vmul.f32 %v1505_v6, %v855_v9  ;;  %1191 = vmatmul.f32.gmra.mxu3 %v1039_v10  ;;  %v853_v29 = vsel %vm852_vm2, %v1503_v46, %v849_v36 }
 0x20f   : > { %v756_v53 = vadd.f32 %v711_v44, %v710_v20  ;;  %v964_v33 = vmul.f32 %v853_v29, %v2183_v15  ;;  %v965_v1 = vmul.f32 %v853_v29, %v2187_v16  ;;  %v2615_v15 = vmax.f32 %v2251_v38, 0.0 }
 0x210   : > { %v857_v5 = vmul.f32 0.5, %v856_v22  ;;  %v626_v61 = vpop.xlane.xlu0 %625 }
 0x211   : > { %v649_v19 = vmul.f32 %v2057_v62, %v626_v61  ;;  %757 = vadd.xlane.f32.xlu0 %v756_v53  ;;  %v1002_v2 = vmul.f32 %v2289_v39, %v964_v33  ;;  %v1003_v14 = vmul.f32 %v2296_v37, %v965_v1 }
 0x212   : > { %v858_v24 = vsub.f32 1.5, %v857_v5 }
 0x213   : > { %v1507_v25 = vpop.eup %1506  ;;  %v2430_v46 = vsub.f32 %v2614_v17, %v649_v19  ;;  %v2434_v57 = vsub.f32 %v2615_v15, %v649_v19  ;;  %v1040_v16 = vadd.f32 %v2299_v21, %v1002_v2  ;;  %v1041_v42 = vadd.f32 %v2302_v3, %v1003_v14 }
 0x214   : > { %v859_v27 = vmul.f32 %v1505_v6, %v858_v24  ;;  %v865_v8 = vmul.f32 %v1507_v25, %v785_v41  ;;  %vm871_vm6 = vweird.f32 %v1507_v25 }
 0x215   : > { %1129 = vmatmul.f32.gmra.mxu2 %v1040_v16  ;;  %v712_v13 = vmul.f32 %v2430_v46, %v2430_v46  ;;  %v713_v52 = vmul.f32 %v2434_v57, %v2434_v57  ;;  %vm872_vm8 = vmor %vm870_vm7, %vm871_vm6 }
 0x216   : > { %v866_v45 = vmul.f32 %v1507_v25, %v865_v8  ;;  %1194 = vmatmul.f32.gmra.mxu3 %v1041_v42  ;;  %v863_v38 = vsel %vm862_vm5, %v1505_v6, %v859_v27 }
 0x217   : > { %v759_v50 = vadd.f32 %v713_v52, %v712_v13  ;;  %v966_v32 = vmul.f32 %v863_v38, %v2208_v43  ;;  %v967_v58 = vmul.f32 %v863_v38, %v2212_v18 }
 0x218   : > { %v867_v59 = vmul.f32 0.5, %v866_v45  ;;  %v2464_v45 = vld [vmem:[%s2592_s6] ss:$0 sm:$0xff] }
 0x219   : > { %760 = vadd.xlane.f32.xlu1 %v759_v50  ;;  %v1004_v4 = vmul.f32 %v2289_v39, %v966_v32  ;;  %v1005_v55 = vmul.f32 %v2296_v37, %v967_v58 }
 0x21a   : > { %v868_v56 = vsub.f32 1.5, %v867_v59 }
 0x21b   : > { %v1042_v40 = vadd.f32 %v2299_v21, %v1004_v4  ;;  %v1043_v35 = vadd.f32 %v2302_v3, %v1005_v55 }
 0x21c   : > { %v869_v60 = vmul.f32 %v1507_v25, %v868_v56 }
 0x21d   : > { %1132 = vmatmul.f32.gmra.mxu2 %v1042_v40 }
 0x21e   : > { %1197 = vmatmul.f32.gmra.mxu3 %v1043_v35  ;;  %v873_v43 = vsel %vm872_vm8, %v1507_v25, %v869_v60 }
 0x21f   : > { %v968_v18 = vmul.f32 %v873_v43, %v2233_v51  ;;  %v969_v6 = vmul.f32 %v873_v43, %v2237_v11 }
 0x221   : > { %v1006_v36 = vmul.f32 %v2289_v39, %v968_v18  ;;  %v1007_v9 = vmul.f32 %v2296_v37, %v969_v6 }
 0x223   : > { %v1044_v10 = vadd.f32 %v2299_v21, %v1006_v36  ;;  %v1045_v20 = vadd.f32 %v2302_v3, %v1007_v9 }
 0x225   : > { %1135 = vmatmul.f32.gmra.mxu2 %v1044_v10 }
 0x226   : > { %1200 = vmatmul.f32.gmra.mxu3 %v1045_v20 }
 0x254   : > { %v740_v44 = vpop.xlane.xlu2 %739 }
 0x255   : > { %v770_v41 = vmul.f32 %v740_v44, %v2057_v62 }
 0x257   : > { %v786_v22 = vadd.f32 1e-05, %v770_v41 }
 0x259   : > { %1508 = vrsqrt.f32 %v786_v22  ;;  %vm880_vm10 = vweird.f32 %v786_v22 }
 0x25c   : > { %v743_v29 = vpop.xlane.xlu1 %742 }
 0x25d   : > { %v771_v51 = vmul.f32 %v743_v29, %v2057_v62 }
 0x25f   : > { %v1509_v53 = vpop.eup %1508  ;;  %v787_v11 = vadd.f32 1e-05, %v771_v51 }
 0x260   : > { %v875_v33 = vmul.f32 %v1509_v53, %v786_v22  ;;  %vm881_vm9 = vweird.f32 %v1509_v53 }
 0x261   : > { %1510 = vrsqrt.f32 %v787_v11  ;;  %vm882_vm11 = vmor %vm880_vm10, %vm881_vm9  ;;  %vm890_vm13 = vweird.f32 %v787_v11 }
 0x262   : > { %v876_v1 = vmul.f32 %v1509_v53, %v875_v33 }
 0x264   : > { %v877_v5 = vmul.f32 0.5, %v876_v1  ;;  %v746_v61 = vpop.xlane.xlu2 %745 }
 0x265   : > { %v772_v19 = vmul.f32 %v746_v61, %v2057_v62 }
 0x266   : > { %v878_v2 = vsub.f32 1.5, %v877_v5 }
 0x267   : > { %v1511_v14 = vpop.eup %1510  ;;  %v788_v24 = vadd.f32 1e-05, %v772_v19 }
 0x268   : > { %v879_v25 = vmul.f32 %v1509_v53, %v878_v2  ;;  %v885_v17 = vmul.f32 %v1511_v14, %v787_v11  ;;  %vm891_vm12 = vweird.f32 %v1511_v14 }
 0x269   : > { %1512 = vrsqrt.f32 %v788_v24  ;;  %vm892_vm14 = vmor %vm890_vm13, %vm891_vm12  ;;  %vm900_vm0 = vweird.f32 %v788_v24 }
 0x26a   : > { %v886_v15 = vmul.f32 %v1511_v14, %v885_v17  ;;  %v883_v16 = vsel %vm882_vm11, %v1509_v53, %v879_v25 }
 0x26b   : > { %v970_v42 = vmul.f32 %v883_v16, %v2264_v34  ;;  %v971_v27 = vmul.f32 %v883_v16, %v2268_v63 }
 0x26c   : > { %v887_v8 = vmul.f32 0.5, %v886_v15  ;;  %v749_v13 = vpop.xlane.xlu0 %748 }
 0x26d   : > { %v773_v52 = vmul.f32 %v749_v13, %v2057_v62  ;;  %v1008_v38 = vmul.f32 %v2289_v39, %v970_v42  ;;  %v1009_v50 = vmul.f32 %v2296_v37, %v971_v27 }
 0x26e   : > { %v888_v32 = vsub.f32 1.5, %v887_v8 }
 0x26f   : > { %v1513_v58 = vpop.eup %1512  ;;  %v789_v59 = vadd.f32 1e-05, %v773_v52  ;;  %v1046_v34 = vadd.f32 %v2299_v21, %v1008_v38  ;;  %v1047_v63 = vadd.f32 %v2302_v3, %v1009_v50 }
 0x270   : > { %v889_v4 = vmul.f32 %v1511_v14, %v888_v32  ;;  %v895_v55 = vmul.f32 %v1513_v58, %v788_v24  ;;  %v1115_v56 = vpop.f32.mrf.mxu2  ;;  %vm901_vm15 = vweird.f32 %v1513_v58 }
 0x271   : > { %1514 = vrsqrt.f32 %v789_v59  ;;  %v1116_v40 = vadd.f32 %v2464_v45, %v1115_v56  ;;  %v1180_v35 = vpop.f32.mrf.mxu3  ;;  %1138 = vmatmul.f32.gmra.mxu2 %v1046_v34  ;;  %1203 = vmatmul.f32.gmra.mxu3 %v1047_v63  ;;  %vm902_vm1 = vmor %vm900_vm0, %vm901_vm15  ;;  %vm910_vm3 = vweird.f32 %v789_v59 }
 0x272   : > { %v896_v60 = vmul.f32 %v1513_v58, %v895_v55  ;;  %v893_v43 = vsel %vm892_vm14, %v1511_v14, %v889_v4 }
 0x273   : > { %v1181_v18 = vadd.f32 %v1180_v35, %v1116_v40  ;;  %v972_v6 = vmul.f32 %v893_v43, %v2283_v49  ;;  %v973_v36 = vmul.f32 %v893_v43, %v2287_v26 }
 0x274   : > { %v897_v9 = vmul.f32 0.5, %v896_v60  ;;  %v752_v10 = vpop.xlane.xlu1 %751 }
 0x275   : > { %1228 = vst [vmem:[%s2475_s22] sm:$0xff] %v1181_v18  ;;  %v774_v20 = vmul.f32 %v752_v10, %v2057_v62  ;;  %v1010_v44 = vmul.f32 %v2289_v39, %v972_v6  ;;  %v1011_v41 = vmul.f32 %v2296_v37, %v973_v36 }
 0x276   : > { %v898_v22 = vsub.f32 1.5, %v897_v9 }
 0x277   : > { %v1515_v29 = vpop.eup %1514  ;;  %v790_v51 = vadd.f32 1e-05, %v774_v20  ;;  %v1048_v49 = vadd.f32 %v2299_v21, %v1010_v44  ;;  %v1049_v26 = vadd.f32 %v2302_v3, %v1011_v41 }
 0x278   : > { %v899_v53 = vmul.f32 %v1513_v58, %v898_v22  ;;  %v905_v11 = vmul.f32 %v1515_v29, %v789_v59  ;;  %v1118_v33 = vpop.f32.mrf.mxu2  ;;  %vm911_vm2 = vweird.f32 %v1515_v29 }
 0x279   : > { %1516 = vrsqrt.f32 %v790_v51  ;;  %v1119_v1 = vadd.f32 %v2464_v45, %v1118_v33  ;;  %v1183_v5 = vpop.f32.mrf.mxu3  ;;  %1141 = vmatmul.f32.gmra.mxu2 %v1048_v49  ;;  %1206 = vmatmul.f32.gmra.mxu3 %v1049_v26  ;;  %vm912_vm4 = vmor %vm910_vm3, %vm911_vm2  ;;  %vm920_vm6 = vweird.f32 %v790_v51 }
 0x27a   : > { %v906_v61 = vmul.f32 %v1515_v29, %v905_v11  ;;  %v903_v19 = vsel %vm902_vm1, %v1513_v58, %v899_v53 }
 0x27b   : > { %v1184_v2 = vadd.f32 %v1183_v5, %v1119_v1  ;;  %v974_v14 = vmul.f32 %v903_v19, %v2310_v7  ;;  %v975_v25 = vmul.f32 %v903_v19, %v2314_v12 }
 0x27c   : > { %v907_v17 = vmul.f32 0.5, %v906_v61  ;;  %v755_v15 = vpop.xlane.xlu2 %754 }
 0x27d   : > { %1229 = vst [vmem:[%s2475_s22 + $0x8] sm:$0xff] %v1184_v2  ;;  %v775_v24 = vmul.f32 %v755_v15, %v2057_v62  ;;  %v1012_v16 = vmul.f32 %v2289_v39, %v974_v14  ;;  %v1013_v42 = vmul.f32 %v2296_v37, %v975_v25 }
 0x27e   : > { %v908_v27 = vsub.f32 1.5, %v907_v17 }
 0x27f   : > { %v1517_v8 = vpop.eup %1516  ;;  %v791_v13 = vadd.f32 1e-05, %v775_v24  ;;  %v1050_v52 = vadd.f32 %v2299_v21, %v1012_v16  ;;  %v1051_v38 = vadd.f32 %v2302_v3, %v1013_v42 }
 0x280   : > { %v909_v7 = vmul.f32 %v1515_v29, %v908_v27  ;;  %v915_v12 = vmul.f32 %v1517_v8, %v790_v51  ;;  %v1121_v50 = vpop.f32.mrf.mxu2  ;;  %vm921_vm5 = vweird.f32 %v1517_v8 }
 0x281   : > { %1518 = vrsqrt.f32 %v791_v13  ;;  %v1122_v32 = vadd.f32 %v2464_v45, %v1121_v50  ;;  %v1186_v58 = vpop.f32.mrf.mxu3  ;;  %1144 = vmatmul.f32.gmra.mxu2 %v1050_v52  ;;  %1209 = vmatmul.f32.gmra.mxu3 %v1051_v38  ;;  %vm922_vm7 = vmor %vm920_vm6, %vm921_vm5  ;;  %vm930_vm9 = vweird.f32 %v791_v13 }
 0x282   : > { %v916_v34 = vmul.f32 %v1517_v8, %v915_v12  ;;  %v913_v63 = vsel %vm912_vm4, %v1515_v29, %v909_v7 }
 0x283   : > { %v1187_v4 = vadd.f32 %v1186_v58, %v1122_v32  ;;  %v976_v55 = vmul.f32 %v913_v63, %v2334_v23  ;;  %v977_v56 = vmul.f32 %v913_v63, %v2338_v28 }
 0x284   : > { %v917_v40 = vmul.f32 0.5, %v916_v34  ;;  %v758_v35 = vpop.xlane.xlu0 %757 }
 0x285   : > { %1230 = vst [vmem:[%s2475_s22 + $0x10] sm:$0xff] %v1187_v4  ;;  %v776_v59 = vmul.f32 %v758_v35, %v2057_v62  ;;  %v1014_v60 = vmul.f32 %v2289_v39, %v976_v55  ;;  %v1015_v43 = vmul.f32 %v2296_v37, %v977_v56 }
 0x286   : > { %v918_v18 = vsub.f32 1.5, %v917_v40 }
 0x287   : > { %v1519_v6 = vpop.eup %1518  ;;  %v792_v36 = vadd.f32 1e-05, %v776_v59  ;;  %v1052_v9 = vadd.f32 %v2299_v21, %v1014_v60  ;;  %v1053_v10 = vadd.f32 %v2302_v3, %v1015_v43 }
 0x288   : > { %v919_v23 = vmul.f32 %v1517_v8, %v918_v18  ;;  %v925_v28 = vmul.f32 %v1519_v6, %v791_v13  ;;  %v1124_v20 = vpop.f32.mrf.mxu2  ;;  %vm931_vm8 = vweird.f32 %v1519_v6 }
 0x289   : > { %1520 = vrsqrt.f32 %v792_v36  ;;  %v1125_v44 = vadd.f32 %v2464_v45, %v1124_v20  ;;  %v1189_v41 = vpop.f32.mrf.mxu3  ;;  %1147 = vmatmul.f32.gmra.mxu2 %v1052_v9  ;;  %1212 = vmatmul.f32.gmra.mxu3 %v1053_v10  ;;  %vm932_vm10 = vmor %vm930_vm9, %vm931_vm8  ;;  %vm940_vm12 = vweird.f32 %v792_v36 }
 0x28a   : > { %v926_v22 = vmul.f32 %v1519_v6, %v925_v28  ;;  %v923_v29 = vsel %vm922_vm7, %v1517_v8, %v919_v23 }
 0x28b   : > { %v1190_v49 = vadd.f32 %v1189_v41, %v1125_v44  ;;  %v978_v26 = vmul.f32 %v923_v29, %v2361_v47  ;;  %v979_v53 = vmul.f32 %v923_v29, %v2365_v48 }
 0x28c   : > { %v927_v11 = vmul.f32 0.5, %v926_v22  ;;  %v761_v33 = vpop.xlane.xlu1 %760 }
 0x28d   : > { %1231 = vst [vmem:[%s2475_s22 + $0x18] sm:$0xff] %v1190_v49  ;;  %v777_v51 = vmul.f32 %v761_v33, %v2057_v62  ;;  %v1016_v1 = vmul.f32 %v2289_v39, %v978_v26  ;;  %v1017_v5 = vmul.f32 %v2296_v37, %v979_v53 }
 0x28e   : > { %v928_v61 = vsub.f32 1.5, %v927_v11 }
 0x28f   : > { %v1521_v19 = vpop.eup %1520  ;;  %v793_v2 = vadd.f32 1e-05, %v777_v51  ;;  %v1054_v14 = vadd.f32 %v2299_v21, %v1016_v1  ;;  %v1055_v25 = vadd.f32 %v2302_v3, %v1017_v5 }
 0x290   : > { %v929_v47 = vmul.f32 %v1519_v6, %v928_v61  ;;  %v935_v48 = vmul.f32 %v1521_v19, %v792_v36  ;;  %v1127_v17 = vpop.f32.mrf.mxu2  ;;  %vm941_vm11 = vweird.f32 %v1521_v19 }
 0x291   : > { %1522 = vrsqrt.f32 %v793_v2  ;;  %v1128_v62 = vadd.f32 %v2464_v45, %v1127_v17  ;;  %v1192_v15 = vpop.f32.mrf.mxu3  ;;  %1150 = vmatmul.f32.gmra.mxu2 %v1054_v14  ;;  %1215 = vmatmul.f32.gmra.mxu3 %v1055_v25  ;;  %vm942_vm13 = vmor %vm940_vm12, %vm941_vm11  ;;  %vm950_vm15 = vweird.f32 %v793_v2 }
 0x292   : > { %v936_v24 = vmul.f32 %v1521_v19, %v935_v48  ;;  %v933_v16 = vsel %vm932_vm10, %v1519_v6, %v929_v47 }
 0x293   : > { %v1193_v42 = vadd.f32 %v1192_v15, %v1128_v62  ;;  %v980_v27 = vmul.f32 %v933_v16, %v2384_v0  ;;  %v981_v8 = vmul.f32 %v933_v16, %v2388_v54 }
 0x294   : > { %v937_v52 = vmul.f32 0.5, %v936_v24 }
 0x295   : > { %1232 = vst [vmem:[%s2475_s22 + $0x20] sm:$0xff] %v1193_v42  ;;  %v1018_v13 = vmul.f32 %v2289_v39, %v980_v27  ;;  %v1019_v38 = vmul.f32 %v2296_v37, %v981_v8 }
 0x296   : > { %v938_v7 = vsub.f32 1.5, %v937_v52 }
 0x297   : > { %v1523_v12 = vpop.eup %1522  ;;  %v1056_v50 = vadd.f32 %v2299_v21, %v1018_v13  ;;  %v1057_v32 = vadd.f32 %v2302_v3, %v1019_v38 }
 0x298   : > { %v939_v58 = vmul.f32 %v1521_v19, %v938_v7  ;;  %v945_v34 = vmul.f32 %v1523_v12, %v793_v2  ;;  %v1130_v0 = vpop.f32.mrf.mxu2  ;;  %vm951_vm14 = vweird.f32 %v1523_v12 }
 0x299   : > { %v1131_v54 = vadd.f32 %v2464_v45, %v1130_v0  ;;  %v1195_v63 = vpop.f32.mrf.mxu3  ;;  %1153 = vmatmul.f32.gmra.mxu2 %v1056_v50  ;;  %1218 = vmatmul.f32.gmra.mxu3 %v1057_v32  ;;  %vm952_vm0 = vmor %vm950_vm15, %vm951_vm14 }
 0x29a   : > { %v946_v4 = vmul.f32 %v1523_v12, %v945_v34  ;;  %v943_v55 = vsel %vm942_vm13, %v1521_v19, %v939_v58 }
 0x29b   : > { %v1196_v56 = vadd.f32 %v1195_v63, %v1131_v54  ;;  %v982_v40 = vmul.f32 %v943_v55, %v2409_v30  ;;  %v983_v35 = vmul.f32 %v943_v55, %v2413_v31 }
 0x29c   : > { %v947_v59 = vmul.f32 0.5, %v946_v4 }
 0x29d   : > { %1233 = vst [vmem:[%s2475_s22 + $0x28] sm:$0xff] %v1196_v56  ;;  %v1020_v60 = vmul.f32 %v2289_v39, %v982_v40  ;;  %v1021_v43 = vmul.f32 %v2296_v37, %v983_v35 }
 0x29e   : > { %v948_v18 = vsub.f32 1.5, %v947_v59 }
 0x29f   : > { %v1058_v6 = vadd.f32 %v2299_v21, %v1020_v60  ;;  %v1059_v36 = vadd.f32 %v2302_v3, %v1021_v43 }
 0x2a0   : > { %v949_v9 = vmul.f32 %v1523_v12, %v948_v18  ;;  %v1133_v10 = vpop.f32.mrf.mxu2 }
 0x2a1   : > { %v1134_v30 = vadd.f32 %v2464_v45, %v1133_v10  ;;  %v1198_v31 = vpop.f32.mrf.mxu3  ;;  %1156 = vmatmul.f32.gmra.mxu2 %v1058_v6  ;;  %1221 = vmatmul.f32.gmra.mxu3 %v1059_v36 }
 0x2a2   : > { %v953_v23 = vsel %vm952_vm0, %v1523_v12, %v949_v9 }
 0x2a3   : > { %v1199_v28 = vadd.f32 %v1198_v31, %v1134_v30  ;;  %v984_v20 = vmul.f32 %v953_v23, %v2430_v46  ;;  %v985_v44 = vmul.f32 %v953_v23, %v2434_v57 }
 0x2a5   : > { %1234 = vst [vmem:[%s2475_s22 + $0x30] sm:$0xff] %v1199_v28  ;;  %v1022_v41 = vmul.f32 %v2289_v39, %v984_v20  ;;  %v1023_v22 = vmul.f32 %v2296_v37, %v985_v44 }
 0x2a7   : > { %v1060_v29 = vadd.f32 %v2299_v21, %v1022_v41  ;;  %v1061_v49 = vadd.f32 %v2302_v3, %v1023_v22 }
 0x2a8   : > { %v1136_v26 = vpop.f32.mrf.mxu2 }
 0x2a9   : > { %v1137_v53 = vadd.f32 %v2464_v45, %v1136_v26  ;;  %1159 = vmatmul.f32.gmra.mxu2 %v1060_v29  ;;  %1224 = vmatmul.f32.gmra.mxu3 %v1061_v49  ;;  %v1201_v11 = vpop.f32.mrf.mxu3 }
 0x2ab   : > { %v1202_v46 = vadd.f32 %v1201_v11, %v1137_v53 }
 0x2ad   : > { %1235 = vst [vmem:[%s2475_s22 + $0x38] sm:$0xff] %v1202_v46 }
 0x2f4   : > { %v1139_v57 = vpop.f32.mrf.mxu2  ;;  %v1204_v33 = vpop.f32.mrf.mxu3 }
 0x2f5   : > { %v1140_v39 = vadd.f32 %v2464_v45, %v1139_v57 }
 0x2f7   : > { %v1205_v51 = vadd.f32 %v1204_v33, %v1140_v39 }
 0x2f9   : > { %1236 = vst [vmem:[%s2475_s22 + $0x40] sm:$0xff] %v1205_v51 }
 0x2fc   : > { %v1142_v37 = vpop.f32.mrf.mxu2  ;;  %v1207_v21 = vpop.f32.mrf.mxu3 }
 0x2fd   : > { %v1143_v3 = vadd.f32 %v2464_v45, %v1142_v37 }
 0x2ff   : > { %v1208_v1 = vadd.f32 %v1207_v21, %v1143_v3 }
 0x301   : > { %1237 = vst [vmem:[%s2475_s22 + $0x48] sm:$0xff] %v1208_v1 }
 0x304   : > { %v1145_v5 = vpop.f32.mrf.mxu2  ;;  %v1210_v61 = vpop.f32.mrf.mxu3 }
 0x305   : > { %v1146_v19 = vadd.f32 %v2464_v45, %v1145_v5 }
 0x307   : > { %v1211_v2 = vadd.f32 %v1210_v61, %v1146_v19 }
 0x309   : > { %1238 = vst [vmem:[%s2475_s22 + $0x50] sm:$0xff] %v1211_v2 }
 0x30c   : > { %v1148_v14 = vpop.f32.mrf.mxu2  ;;  %v1213_v25 = vpop.f32.mrf.mxu3 }
 0x30d   : > { %v1149_v47 = vadd.f32 %v2464_v45, %v1148_v14 }
 0x30f   : > { %v1214_v48 = vadd.f32 %v1213_v25, %v1149_v47 }
 0x311   : > { %1239 = vst [vmem:[%s2475_s22 + $0x58] sm:$0xff] %v1214_v48 }
 0x314   : > { %v1151_v17 = vpop.f32.mrf.mxu2  ;;  %v1216_v62 = vpop.f32.mrf.mxu3 }
 0x315   : > { %v1152_v15 = vadd.f32 %v2464_v45, %v1151_v17 }
 0x317   : > { %v1217_v24 = vadd.f32 %v1216_v62, %v1152_v15 }
 0x319   : > { %1240 = vst [vmem:[%s2475_s22 + $0x60] sm:$0xff] %v1217_v24 }
 0x31c   : > { %v1154_v16 = vpop.f32.mrf.mxu2  ;;  %v1219_v42 = vpop.f32.mrf.mxu3 }
 0x31d   : > { %v1155_v27 = vadd.f32 %v2464_v45, %v1154_v16 }
 0x31f   : > { %v1220_v8 = vadd.f32 %v1219_v42, %v1155_v27 }
 0x321   : > { %1241 = vst [vmem:[%s2475_s22 + $0x68] sm:$0xff] %v1220_v8 }
 0x324   : > { %v1157_v52 = vpop.f32.mrf.mxu2  ;;  %v1222_v13 = vpop.f32.mrf.mxu3 }
 0x325   : > { %v1158_v38 = vadd.f32 %v2464_v45, %v1157_v52 }
 0x327   : > { %v1223_v7 = vadd.f32 %v1222_v13, %v1158_v38 }
 0x329   : > { %1242 = vst [vmem:[%s2475_s22 + $0x70] sm:$0xff] %v1223_v7 }
 0x32c   : > { %v1160_v12 = vpop.f32.mrf.mxu2  ;;  %v1225_v32 = vpop.f32.mrf.mxu3 }
 0x32d   : > { %v1161_v50 = vadd.f32 %v2464_v45, %v1160_v12 }
 0x32f   : > { %v1226_v58 = vadd.f32 %v1225_v32, %v1161_v50 }
 0x331   : > { %1243 = vst [vmem:[%s2475_s22 + $0x78] sm:$0xff] %v1226_v58 }
 0x332   : > { %1701 = shalt.err (!%p1698_p10)
}
 0x333   : > { %s1759_s13 = smov 128   ;;  %s1760_s22 = smov 8  }
 0x334   : > { %1413 = dma.vmem_to_hbm [thread:$0]  (%p1891_p5), %s1258_s15, 2048, %s1260_s17, %s1245_s1, %s1759_s13, %s1759_s13, %s1760_s22  }
 0x335 PF: > { %s1274_s23 = sand.u32 1, %s1736_s24   ;;  %p2616_p12 = scmp.ge.s32.totalorder %s1748_s27, 2 }
 0x336   : > { %s1275_s16 = scalar_lea.sflag [#allocation4], %s1274_s23 }
 0x337   : > { %p1433_p13 = pnand %p2616_p12, %p1836_p6 }
 0x339   : > { %p1434_p0 = pneg %p1433_p13 }
 0x33b   : > { %1731 = dma.done.wait (%p1434_p0), %s1275_s16, 2048  }
 0x33c   : > { %1733 = vsyncadd (%p1434_p0), %s1275_s16, 4294965248  ;;  %p22_p3 = scmp.ge.s32.totalorder %s1878_s21, 4   ;;  %s2617_s24 = smov %s1740_s25 }
 0x33d   : > { %s2618_s25 = smov %s1744_s26  ;;  %s2619_s26 = smov %s1887_s29 }
 0x33e   : > { %s2620_s27 = smov %s1878_s21  ;;  %24 = sbr.rel (!%p22_p3) target bundleno = 9 (0x9), region = 109 }
 0x343   :  { %1281 = vsyncpa [#allocation3], 1 }
 0x344   :  { %1283 = vsyncpa [#allocation3 + $0x1], 1 }
 0x345   :  { %1284 = vsyncpa [#allocation6], 1 }
 0x346   :  { %1285 = vsyncpa [#allocation9], 1 }
 0x347   :  { %1286 = vsyncpa [#allocation4], 1 }
 0x348   :  { %1288 = vsyncpa [#allocation4 + $0x1], 1 }

</bundles_post_ra>
